<compile_context>
chip_gen: v6e
topology: v6e:2x2x1
jax: 0.10.0
libtpu: 0.0.40
codegen_flags: <defaults>
</compile_context>

<pallas_src>
import functools

import jax
import jax.numpy as jnp
from jax import lax
from jax.experimental import pallas as pl
from jax.experimental.pallas import tpu as pltpu


def _attention_layer_kernel(x_ref, w_ref, gamma_ref, beta_ref, o_ref,
                            *, block_n, H, W, Cin, Cout, eps):
    """One grid step processes `block_n` images.

    x_ref    : (block_n, Cin, H+2, W+2) bf16   spatially zero-padded input (native NCHW)
    w_ref    : (9, Cout, Cin)           bf16   conv weights, tap-major (t = dy*3 + dx)
    gamma_ref: (Cout, 1)                f32    instance-norm scale
    beta_ref : (Cout, 1)                f32    instance-norm shift
    o_ref    : (block_n, Cout, H*W)     f32    normalized conv output (NCHW-flat, lane-dense)
    """
    HW = H * W
    w_all = w_ref[...]           # (9, Cout, Cin)
    gamma = gamma_ref[...]       # (Cout, 1)
    beta = beta_ref[...]         # (Cout, 1)

    for n in range(block_n):
        xn = x_ref[n]            # (Cin, H+2, W+2) bf16, loaded once per image

        # --- 3x3 conv as 9 accumulating MXU dots (f32 accumulation) ---
        acc = jnp.zeros((Cout, HW), jnp.float32)
        for t in range(9):
            dy, dx = t // 3, t % 3
            # static shifted view of the padded image; relayout to (Cin, HW) is in-VMEM
            x_tap = xn[:, dy:dy + H, dx:dx + W].reshape(Cin, HW)
            acc = acc + jnp.dot(w_all[t], x_tap, preferred_element_type=jnp.float32)
        # (conv bias omitted: it cancels exactly under the mean subtraction below)

        # --- InstanceNorm2d: per channel, biased variance over the spatial (lane) axis ---
        mean = jnp.mean(acc, axis=1, keepdims=True)          # (Cout, 1)
        centered = acc - mean
        var = jnp.mean(centered * centered, axis=1, keepdims=True)
        inv = lax.rsqrt(var + eps)
        y = centered * inv * gamma + beta                     # (Cout, HW)

        o_ref[n] = y.astype(o_ref.dtype)                      # lane-dense store, last dim = HW


def _pick_block_n(N, H, W, Cin, Cout, vmem_budget_bytes=12 << 20):
    """Largest batch-tile that fits VMEM, keeps >=2 grid steps, and divides N."""
    HW = H * W
    in_bytes = Cin * (H + 2) * (W + 2) * 2       # bf16 padded input block, per sample
    out_bytes = Cout * HW * 4                    # f32 output block, per sample
    interm_bytes = 3 * Cout * HW * 4             # acc / centered / y f32 live values
    per_sample = 2 * in_bytes + 2 * out_bytes + interm_bytes   # double-buffered pipeline
    cap = max(1, vmem_budget_bytes // per_sample)
    cap = min(cap, 8)                            # bound the static per-image unroll
    if N >= 2:
        cap = min(cap, N // 2)                   # >=2 grid steps -> v7x megacore sharding
    for cand in range(min(cap, N), 0, -1):
        if N % cand == 0:
            return cand
    return 1


def attention_layer_pallas(x_nchw, weight_hwio, bias, gamma, beta, *,
                           eps=1e-5, block_n=None):
    """Forward pass of AttentionLayer (Conv2d k=3,s=1,p=1 -> InstanceNorm2d affine).

    x_nchw      : (N, Cin, H, W) f32   (PyTorch NCHW convention)
    weight_hwio : (3, 3, Cin, Cout)
    bias/gamma/beta : (Cout,)
    returns     : (N, Cout, H, W) f32
    """
    del bias  # per-channel conv bias cancels under InstanceNorm's per-(n,c) mean subtraction
    N, Cin, H, W = x_nchw.shape
    Cout = weight_hwio.shape[-1]
    HW = H * W

    # --- single wrapper pass over the input: spatial zero-pad + bf16 cast, native NCHW ---
    x_pad = jnp.pad(x_nchw, ((0, 0), (0, 0), (1, 1), (1, 1))).astype(jnp.bfloat16)

    # weights: (3, 3, Cin, Cout) -> (9, Cout, Cin), tap index t = dy*3 + dx
    w = jnp.transpose(weight_hwio.reshape(9, Cin, Cout), (0, 2, 1)).astype(jnp.bfloat16)
    g2 = gamma.reshape(Cout, 1).astype(jnp.float32)
    b2 = beta.reshape(Cout, 1).astype(jnp.float32)

    if block_n is None:
        block_n = _pick_block_n(N, H, W, Cin, Cout)

    kernel = functools.partial(_attention_layer_kernel,
                               block_n=block_n, H=H, W=W, Cin=Cin, Cout=Cout, eps=eps)

    out_flat = pl.pallas_call(
        kernel,
        out_shape=jax.ShapeDtypeStruct((N, Cout, HW), jnp.float32),
        grid_spec=pltpu.PrefetchScalarGridSpec(
            num_scalar_prefetch=0,
            grid=(N // block_n,),
            in_specs=[
                pl.BlockSpec((block_n, Cin, H + 2, W + 2), lambda g: (g, 0, 0, 0)),
                pl.BlockSpec((9, Cout, Cin), lambda g: (0, 0, 0)),
                pl.BlockSpec((Cout, 1), lambda g: (0, 0)),
                pl.BlockSpec((Cout, 1), lambda g: (0, 0)),
            ],
            out_specs=pl.BlockSpec((block_n, Cout, HW), lambda g: (g, 0, 0)),
        ),
        compiler_params=pltpu.CompilerParams(
            dimension_semantics=("parallel",),
            vmem_limit_bytes=32 * 1024 * 1024),
    )(x_pad, w, g2, b2)

    # (N, Cout, H*W) is already NCHW-flat: un-flattening the spatial axis is free.
    return out_flat.reshape(N, Cout, H, W)


def _reference(x_nchw, weight_hwio, bias, gamma, beta, eps=1e-5):
    """Pure-JAX f32 reference: conv2d(k=3,s=1,p=1) + bias + InstanceNorm2d(affine)."""
    x_nhwc = jnp.transpose(x_nchw, (0, 2, 3, 1))
    conv = lax.conv_general_dilated(
        x_nhwc, weight_hwio, window_strides=(1, 1), padding="SAME",
        dimension_numbers=("NHWC", "HWIO", "NHWC"),
        precision=lax.Precision.HIGHEST)
    conv = conv + bias[None, None, None, :]
    mean = jnp.mean(conv, axis=(1, 2), keepdims=True)
    var = jnp.mean((conv - mean) ** 2, axis=(1, 2), keepdims=True)
    y = (conv - mean) * lax.rsqrt(var + eps)
    y = y * gamma[None, None, None, :] + beta[None, None, None, :]
    return jnp.transpose(y, (0, 3, 1, 2))


if __name__ == "__main__":
    # AttentionLayer(in_channels=4, out_channels=8, norm='instancenorm2d', dim=2)
    N, Cin, Cout, H, W = 2, 4, 8, 16, 16

    key = jax.random.PRNGKey(0)
    kx, kw, kb, kg, kbe = jax.random.split(key, 5)

    x = jax.random.normal(kx, (N, Cin, H, W), jnp.float32)
    weight = jax.random.normal(kw, (3, 3, Cin, Cout), jnp.float32) * 0.1  # HWIO
    bias = jax.random.normal(kb, (Cout,), jnp.float32) * 0.1
    gamma = 1.0 + 0.1 * jax.random.normal(kg, (Cout,), jnp.float32)
    beta = 0.1 * jax.random.normal(kbe, (Cout,), jnp.float32)

    fwd = jax.jit(attention_layer_pallas)
    out = jax.block_until_ready(fwd(x, weight, bias, gamma, beta))

    ref = _reference(x, weight, bias, gamma, beta)
    assert out.shape == (N, Cout, H, W)
    # bf16 MXU operands -> slightly relaxed tolerance vs the pure-f32 reference
    max_diff = jnp.max(jnp.abs(out - ref))
    assert jnp.allclose(out, ref, atol=5e-2, rtol=5e-2), \
        f"mismatch vs reference (max abs diff {max_diff})"

    print("KERNEL_OK")
</pallas_src>

<mosaic_0001>
module attributes {stable_mosaic.version = 11 : i64} {
  func.func @_attention_layer_kernel(%arg0: i32, %arg1: memref<1x4x18x18xbf16, #tpu.memory_space<vmem>>, %arg2: memref<9x8x4xbf16, #tpu.memory_space<vmem>>, %arg3: memref<8x1xf32, #tpu.memory_space<vmem>>, %arg4: memref<8x1xf32, #tpu.memory_space<vmem>>, %arg5: memref<1x8x256xf32, #tpu.memory_space<vmem>>) attributes {dimension_semantics = [#tpu.dimension_semantics<parallel>], iteration_bounds = array<i64: 2>, scalar_prefetch = 0 : i64, scratch_operands = 0 : i64, tpu.core_type = #tpu.core_type<tc>, window_params = [{transform_indices = @transform_0, window_bounds = array<i64: 1, 4, 18, 18>}, {pipeline_mode = #tpu.pipeline_mode<synchronous>, transform_indices = @transform_1, window_bounds = array<i64: 9, 8, 4>}, {pipeline_mode = #tpu.pipeline_mode<synchronous>, transform_indices = @transform_2, window_bounds = array<i64: 8, 1>}, {pipeline_mode = #tpu.pipeline_mode<synchronous>, transform_indices = @transform_3, window_bounds = array<i64: 8, 1>}, {transform_indices = @transform_4, window_bounds = array<i64: 1, 8, 256>}]} {
    %c0 = arith.constant 0 : index
    %c0_0 = arith.constant 0 : index
    %c0_1 = arith.constant 0 : index
    %0 = vector.load %arg2[%c0, %c0_0, %c0_1] : memref<9x8x4xbf16, #tpu.memory_space<vmem>>, vector<9x8x4xbf16>
    %c0_2 = arith.constant 0 : index
    %c0_3 = arith.constant 0 : index
    %1 = vector.load %arg3[%c0_2, %c0_3] : memref<8x1xf32, #tpu.memory_space<vmem>>, vector<8x1xf32>
    %c0_4 = arith.constant 0 : index
    %c0_5 = arith.constant 0 : index
    %2 = vector.load %arg4[%c0_4, %c0_5] : memref<8x1xf32, #tpu.memory_space<vmem>>, vector<8x1xf32>
    %c0_6 = arith.constant 0 : index
    %c0_7 = arith.constant 0 : index
    %c0_8 = arith.constant 0 : index
    %c0_9 = arith.constant 0 : index
    %3 = vector.load %arg1[%c0_6, %c0_7, %c0_8, %c0_9] : memref<1x4x18x18xbf16, #tpu.memory_space<vmem>>, vector<1x4x18x18xbf16>
    %4 = vector.shape_cast %3 : vector<1x4x18x18xbf16> to vector<4x18x18xbf16>
    %cst = arith.constant 0.000000e+00 : f32
    %5 = vector.broadcast %cst : f32 to vector<8x256xf32>
    %6 = vector.extract_strided_slice %4 {offsets = [0, 0, 0], sizes = [4, 16, 16], strides = [1, 1, 1]} : vector<4x18x18xbf16> to vector<4x16x16xbf16>
    %7 = vector.shape_cast %6 : vector<4x16x16xbf16> to vector<4x256xbf16>
    %8 = vector.extract_strided_slice %0 {offsets = [0, 0, 0], sizes = [1, 8, 4], strides = [1, 1, 1]} : vector<9x8x4xbf16> to vector<1x8x4xbf16>
    %9 = vector.shape_cast %8 : vector<1x8x4xbf16> to vector<8x4xbf16>
    %cst_10 = arith.constant dense<0.000000e+00> : vector<8x256xf32>
    %10 = tpu.matmul %9, %7, %cst_10 {dimension_numbers = #tpu.dot_dimension_numbers<[1], [0], [0], [1], [0, 0, 1, 1], [], []>} : vector<8x4xbf16>, vector<4x256xbf16>, vector<8x256xf32> -> vector<8x256xf32>
    %11 = arith.addf %5, %10 : vector<8x256xf32>
    %12 = vector.extract_strided_slice %4 {offsets = [0, 0, 1], sizes = [4, 16, 16], strides = [1, 1, 1]} : vector<4x18x18xbf16> to vector<4x16x16xbf16>
    %13 = vector.shape_cast %12 : vector<4x16x16xbf16> to vector<4x256xbf16>
    %14 = vector.extract_strided_slice %0 {offsets = [1, 0, 0], sizes = [1, 8, 4], strides = [1, 1, 1]} : vector<9x8x4xbf16> to vector<1x8x4xbf16>
    %15 = vector.shape_cast %14 : vector<1x8x4xbf16> to vector<8x4xbf16>
    %cst_11 = arith.constant dense<0.000000e+00> : vector<8x256xf32>
    %16 = tpu.matmul %15, %13, %cst_11 {dimension_numbers = #tpu.dot_dimension_numbers<[1], [0], [0], [1], [0, 0, 1, 1], [], []>} : vector<8x4xbf16>, vector<4x256xbf16>, vector<8x256xf32> -> vector<8x256xf32>
    %17 = arith.addf %11, %16 : vector<8x256xf32>
    %18 = vector.extract_strided_slice %4 {offsets = [0, 0, 2], sizes = [4, 16, 16], strides = [1, 1, 1]} : vector<4x18x18xbf16> to vector<4x16x16xbf16>
    %19 = vector.shape_cast %18 : vector<4x16x16xbf16> to vector<4x256xbf16>
    %20 = vector.extract_strided_slice %0 {offsets = [2, 0, 0], sizes = [1, 8, 4], strides = [1, 1, 1]} : vector<9x8x4xbf16> to vector<1x8x4xbf16>
    %21 = vector.shape_cast %20 : vector<1x8x4xbf16> to vector<8x4xbf16>
    %cst_12 = arith.constant dense<0.000000e+00> : vector<8x256xf32>
    %22 = tpu.matmul %21, %19, %cst_12 {dimension_numbers = #tpu.dot_dimension_numbers<[1], [0], [0], [1], [0, 0, 1, 1], [], []>} : vector<8x4xbf16>, vector<4x256xbf16>, vector<8x256xf32> -> vector<8x256xf32>
    %23 = arith.addf %17, %22 : vector<8x256xf32>
    %24 = vector.extract_strided_slice %4 {offsets = [0, 1, 0], sizes = [4, 16, 16], strides = [1, 1, 1]} : vector<4x18x18xbf16> to vector<4x16x16xbf16>
    %25 = vector.shape_cast %24 : vector<4x16x16xbf16> to vector<4x256xbf16>
    %26 = vector.extract_strided_slice %0 {offsets = [3, 0, 0], sizes = [1, 8, 4], strides = [1, 1, 1]} : vector<9x8x4xbf16> to vector<1x8x4xbf16>
    %27 = vector.shape_cast %26 : vector<1x8x4xbf16> to vector<8x4xbf16>
    %cst_13 = arith.constant dense<0.000000e+00> : vector<8x256xf32>
    %28 = tpu.matmul %27, %25, %cst_13 {dimension_numbers = #tpu.dot_dimension_numbers<[1], [0], [0], [1], [0, 0, 1, 1], [], []>} : vector<8x4xbf16>, vector<4x256xbf16>, vector<8x256xf32> -> vector<8x256xf32>
    %29 = arith.addf %23, %28 : vector<8x256xf32>
    %30 = vector.extract_strided_slice %4 {offsets = [0, 1, 1], sizes = [4, 16, 16], strides = [1, 1, 1]} : vector<4x18x18xbf16> to vector<4x16x16xbf16>
    %31 = vector.shape_cast %30 : vector<4x16x16xbf16> to vector<4x256xbf16>
    %32 = vector.extract_strided_slice %0 {offsets = [4, 0, 0], sizes = [1, 8, 4], strides = [1, 1, 1]} : vector<9x8x4xbf16> to vector<1x8x4xbf16>
    %33 = vector.shape_cast %32 : vector<1x8x4xbf16> to vector<8x4xbf16>
    %cst_14 = arith.constant dense<0.000000e+00> : vector<8x256xf32>
    %34 = tpu.matmul %33, %31, %cst_14 {dimension_numbers = #tpu.dot_dimension_numbers<[1], [0], [0], [1], [0, 0, 1, 1], [], []>} : vector<8x4xbf16>, vector<4x256xbf16>, vector<8x256xf32> -> vector<8x256xf32>
    %35 = arith.addf %29, %34 : vector<8x256xf32>
    %36 = vector.extract_strided_slice %4 {offsets = [0, 1, 2], sizes = [4, 16, 16], strides = [1, 1, 1]} : vector<4x18x18xbf16> to vector<4x16x16xbf16>
    %37 = vector.shape_cast %36 : vector<4x16x16xbf16> to vector<4x256xbf16>
    %38 = vector.extract_strided_slice %0 {offsets = [5, 0, 0], sizes = [1, 8, 4], strides = [1, 1, 1]} : vector<9x8x4xbf16> to vector<1x8x4xbf16>
    %39 = vector.shape_cast %38 : vector<1x8x4xbf16> to vector<8x4xbf16>
    %cst_15 = arith.constant dense<0.000000e+00> : vector<8x256xf32>
    %40 = tpu.matmul %39, %37, %cst_15 {dimension_numbers = #tpu.dot_dimension_numbers<[1], [0], [0], [1], [0, 0, 1, 1], [], []>} : vector<8x4xbf16>, vector<4x256xbf16>, vector<8x256xf32> -> vector<8x256xf32>
    %41 = arith.addf %35, %40 : vector<8x256xf32>
    %42 = vector.extract_strided_slice %4 {offsets = [0, 2, 0], sizes = [4, 16, 16], strides = [1, 1, 1]} : vector<4x18x18xbf16> to vector<4x16x16xbf16>
    %43 = vector.shape_cast %42 : vector<4x16x16xbf16> to vector<4x256xbf16>
    %44 = vector.extract_strided_slice %0 {offsets = [6, 0, 0], sizes = [1, 8, 4], strides = [1, 1, 1]} : vector<9x8x4xbf16> to vector<1x8x4xbf16>
    %45 = vector.shape_cast %44 : vector<1x8x4xbf16> to vector<8x4xbf16>
    %cst_16 = arith.constant dense<0.000000e+00> : vector<8x256xf32>
    %46 = tpu.matmul %45, %43, %cst_16 {dimension_numbers = #tpu.dot_dimension_numbers<[1], [0], [0], [1], [0, 0, 1, 1], [], []>} : vector<8x4xbf16>, vector<4x256xbf16>, vector<8x256xf32> -> vector<8x256xf32>
    %47 = arith.addf %41, %46 : vector<8x256xf32>
    %48 = vector.extract_strided_slice %4 {offsets = [0, 2, 1], sizes = [4, 16, 16], strides = [1, 1, 1]} : vector<4x18x18xbf16> to vector<4x16x16xbf16>
    %49 = vector.shape_cast %48 : vector<4x16x16xbf16> to vector<4x256xbf16>
    %50 = vector.extract_strided_slice %0 {offsets = [7, 0, 0], sizes = [1, 8, 4], strides = [1, 1, 1]} : vector<9x8x4xbf16> to vector<1x8x4xbf16>
    %51 = vector.shape_cast %50 : vector<1x8x4xbf16> to vector<8x4xbf16>
    %cst_17 = arith.constant dense<0.000000e+00> : vector<8x256xf32>
    %52 = tpu.matmul %51, %49, %cst_17 {dimension_numbers = #tpu.dot_dimension_numbers<[1], [0], [0], [1], [0, 0, 1, 1], [], []>} : vector<8x4xbf16>, vector<4x256xbf16>, vector<8x256xf32> -> vector<8x256xf32>
    %53 = arith.addf %47, %52 : vector<8x256xf32>
    %54 = vector.extract_strided_slice %4 {offsets = [0, 2, 2], sizes = [4, 16, 16], strides = [1, 1, 1]} : vector<4x18x18xbf16> to vector<4x16x16xbf16>
    %55 = vector.shape_cast %54 : vector<4x16x16xbf16> to vector<4x256xbf16>
    %56 = vector.extract_strided_slice %0 {offsets = [8, 0, 0], sizes = [1, 8, 4], strides = [1, 1, 1]} : vector<9x8x4xbf16> to vector<1x8x4xbf16>
    %57 = vector.shape_cast %56 : vector<1x8x4xbf16> to vector<8x4xbf16>
    %cst_18 = arith.constant dense<0.000000e+00> : vector<8x256xf32>
    %58 = tpu.matmul %57, %55, %cst_18 {dimension_numbers = #tpu.dot_dimension_numbers<[1], [0], [0], [1], [0, 0, 1, 1], [], []>} : vector<8x4xbf16>, vector<4x256xbf16>, vector<8x256xf32> -> vector<8x256xf32>
    %59 = arith.addf %53, %58 : vector<8x256xf32>
    %cst_19 = arith.constant dense<0.000000e+00> : vector<8xf32>
    %60 = vector.multi_reduction <add>, %59, %cst_19 [1] : vector<8x256xf32> to vector<8xf32>
    %61 = vector.shape_cast %60 : vector<8xf32> to vector<8x1xf32>
    %cst_20 = arith.constant 2.560000e+02 : f32
    %62 = vector.broadcast %cst_20 : f32 to vector<8x1xf32>
    %63 = arith.divf %61, %62 : vector<8x1xf32>
    %64 = vector.broadcast %63 : vector<8x1xf32> to vector<8x256xf32>
    %65 = arith.subf %59, %64 : vector<8x256xf32>
    %66 = arith.mulf %65, %65 : vector<8x256xf32>
    %cst_21 = arith.constant dense<0.000000e+00> : vector<8xf32>
    %67 = vector.multi_reduction <add>, %66, %cst_21 [1] : vector<8x256xf32> to vector<8xf32>
    %68 = vector.shape_cast %67 : vector<8xf32> to vector<8x1xf32>
    %cst_22 = arith.constant 2.560000e+02 : f32
    %69 = vector.broadcast %cst_22 : f32 to vector<8x1xf32>
    %70 = arith.divf %68, %69 : vector<8x1xf32>
    %cst_23 = arith.constant 9.99999974E-6 : f32
    %71 = vector.broadcast %cst_23 : f32 to vector<8x1xf32>
    %72 = arith.addf %70, %71 : vector<8x1xf32>
    %73 = math.rsqrt %72 : vector<8x1xf32>
    %74 = vector.broadcast %73 : vector<8x1xf32> to vector<8x256xf32>
    %75 = arith.mulf %65, %74 : vector<8x256xf32>
    %76 = vector.broadcast %1 : vector<8x1xf32> to vector<8x256xf32>
    %77 = arith.mulf %75, %76 : vector<8x256xf32>
    %78 = vector.broadcast %2 : vector<8x1xf32> to vector<8x256xf32>
    %79 = arith.addf %77, %78 : vector<8x256xf32>
    %c0_24 = arith.constant 0 : index
    %c0_25 = arith.constant 0 : index
    %c0_26 = arith.constant 0 : index
    %80 = vector.load %arg5[%c0_24, %c0_25, %c0_26] : memref<1x8x256xf32, #tpu.memory_space<vmem>>, vector<1x8x256xf32>
    %81 = vector.shape_cast %80 : vector<1x8x256xf32> to vector<8x256xf32>
    %82 = vector.shape_cast %79 : vector<8x256xf32> to vector<1x8x256xf32>
    tpu.vector_store %arg5[%c0_24, %c0_25, %c0_26], %82 {strides = array<i32>} : memref<1x8x256xf32, #tpu.memory_space<vmem>>, vector<1x8x256xf32>,
    return
  }
  func.func @transform_0(%arg0: i32) -> (i32, i32, i32, i32) {
    %c0_i32 = arith.constant 0 : i32
    %c0_i32_0 = arith.constant 0 : i32
    %c0_i32_1 = arith.constant 0 : i32
    %c0_i32_2 = arith.constant 0 : i32
    return %arg0, %c0_i32, %c0_i32_0, %c0_i32_1 : i32, i32, i32, i32
  }
  func.func @transform_1(%arg0: i32) -> (i32, i32, i32) {
    %c0_i32 = arith.constant 0 : i32
    %c0_i32_0 = arith.constant 0 : i32
    %c0_i32_1 = arith.constant 0 : i32
    %c0_i32_2 = arith.constant 0 : i32
    return %c0_i32, %c0_i32_0, %c0_i32_1 : i32, i32, i32
  }
  func.func @transform_2(%arg0: i32) -> (i32, i32) {
    %c0_i32 = arith.constant 0 : i32
    %c0_i32_0 = arith.constant 0 : i32
    %c0_i32_1 = arith.constant 0 : i32
    return %c0_i32, %c0_i32_0 : i32, i32
  }
  func.func @transform_3(%arg0: i32) -> (i32, i32) {
    %c0_i32 = arith.constant 0 : i32
    %c0_i32_0 = arith.constant 0 : i32
    %c0_i32_1 = arith.constant 0 : i32
    return %c0_i32, %c0_i32_0 : i32, i32
  }
  func.func @transform_4(%arg0: i32) -> (i32, i32, i32) {
    %c0_i32 = arith.constant 0 : i32
    %c0_i32_0 = arith.constant 0 : i32
    %c0_i32_1 = arith.constant 0 : i32
    return %arg0, %c0_i32, %c0_i32_0 : i32, i32, i32
  }
}

</mosaic_0001>

<bundles_post_ra>
// kernel: attention_layer_pallas.1
= control target key start
LH: loop header
LB: loop body
LE: loop exit
PB: predicated region body
PF: predicated region fallthrough
CT: control target
= control target key end

     0   :  { %s3628_s15 = smov 0   ;;  %s5149_s0 = inlined_call_operand.vmem [shape: bf16[2,4,18,18], index: 0, kind: input, shape index: {}]   ;;  %s5150_s1 = inlined_call_operand.vmem [shape: bf16[9,8,4], index: 1, kind: input, shape index: {}]   ;;  %s5151_s2 = inlined_call_operand.vmem [shape: f32[8,1], index: 2, kind: input, shape index: {}]   ;;  %s5152_s3 = inlined_call_operand.vmem [shape: f32[8,1], index: 3, kind: input, shape index: {}]   ;;  %s5153_s4 = inlined_call_operand.vmem [shape: f32[2,8,256], index: 4, kind: output, shape index: {}]  }
   0x1 LB: > { %s3327_s16 = sadd.s32 4294967295, %s3589_s15   ;;  %p3331_p0 = scmp.ge.s32.totalorder %s3589_s15, 1  ;;  %s3589_s15 = sphi %s3628_s15, %s14_s15  }
   0x2   : > { %p162_p1 = scmp.lt.s32.totalorder %s3589_s15, 3 }
   0x4   : > { %p163_p2 = pnand %p3331_p0, %p162_p1 }
   0x6   : > { %166 = sbr.rel (%p163_p2) target bundleno = 1020 (0x3fc), region = 36 }
   0xb   : > { %p188_p3 = scmp.lt.s32.totalorder %s3327_s16, 1  ;;  %s3591_s21 = smov 127   ;;  %vm1197_vm0 = vsmask.f32 3328  ;;  %vm1198_vm1 = vsmask.f32 7440  ;;  %v250_v39 = vlaneseq }
   0xc   : > { %vm3703_vm2 = vmor %vm1197_vm0, %vm1198_vm1  ;;  %vm2246_vm3 = vcmask 1042432   ;;  %vm2247_vm4 = vcmask 1046532   ;;  %s3592_s22 = smov 126   ;;  %s3595_s23 = smov 16   ;;  %vm452_vm6 = vcmask 130048   ;;  %vm456_vm7 = vcmask 261120  }
   0xd   : > { %s5227_s16 = smov (!%p188_p3, %s3327_s16), 1  ;;  %vm3780_vm5 = vmor %vm2246_vm3, %vm2247_vm4  ;;  %s3596_s24 = smov 32   ;;  %vm459_vm8 = vcmask 392192   ;;  %vm462_vm9 = vcmask 523264   ;;  %vm465_vm10 = vcmask 654336   ;;  %vm468_vm11 = vcmask 785408  }
   0xe   : > { %s3558_s17 = smul.u32 48, %s5227_s16  ;;  %s3597_s25 = smov 48   ;;  %vm471_vm12 = vcmask 916480   ;;  %vm777_vm13 = vcmask 1041408   ;;  %vm773_vm14 = vcmask 31744  }
   0xf   : > { %s3598_s26 = smov 64   ;;  %s3599_s27 = smov 96  }
  0x10   : > { %s3642_s20 = scalar_lea.vmem %s5149_s0, %s3558_s17  ;;  %s3600_s28 = smov 80  }
  0x11   : > { %v3645_v0 = vld [vmem:[%s3642_s20 + $0xc] sm:$0xf]  ;;  %v3648_v1 = vld [vmem:[%s3642_s20] sm:$0xf]  ;;  %v3655_v2 = vld [vmem:[%s3642_s20 + $0x10] sm:$0xf] }
  0x12   : > { %501 = vrot.lane.b32.xlu1 %v3645_v0, %s3591_s21  ;;  %497 = vrot.lane.b32.xlu0 %v3648_v1, %s3591_s21  ;;  %v3658_v3 = vld [vmem:[%s3642_s20 + $0x4] sm:$0xf]  ;;  %v225_v4 = vshrl.u32 %v3648_v1, 16  ;;  %v1202_v5 = vshll.u32 %v3648_v1, 16  ;;  %v224_v6 = vpack.i.b16 %v3645_v0, %v3648_v1  ;;  %v3667_v8 = vld [vmem:[%s3642_s20 + $0x8] sm:$0x1] }
  0x13   : > { %v236_v7 = vpack.i.b16 %v3655_v2, %v3658_v3  ;;  %v237_v9 = vshrl.u32 %v3658_v3, 16  ;;  %v1207_v10 = vshll.u32 %v3658_v3, 16  ;;  %v1216_v13 = vshll.u32 %v3667_v8, 16  ;;  %v3675_v14 = vld [vmem:[%s3642_s20 + $0x14] sm:$0x1]  ;;  %s3601_s29 = smov 112  }
  0x14   : > { %v1201_v11 = vrot.slane %v225_v4, 4  ;;  %v1204_v12 = vrot.slane %v1202_v5, 5  ;;  %v238_v15 = vshrl.u32 %v3655_v2, 16  ;;  %v1227_v16 = vshll.u32 %v3655_v2, 16  ;;  %v3685_v18 = vld [vmem:[%s3642_s20 + $0x1c] sm:$0xf] }
  0x15   : > { %v226_v17 = vshrl.u32 %v3645_v0, 16  ;;  %v1209_v19 = vrot.slane %v1207_v10, 5  ;;  %v1212_v20 = vrot.slane %v237_v9, 4  ;;  %v1236_v22 = vshll.u32 %v3675_v14, 16  ;;  %v3691_v23 = vld [vmem:[%s3642_s20 + $0x18] sm:$0xf] }
  0x16   : > { %503 = vrot.lane.b32.xlu1 %v3655_v2, %s3591_s21  ;;  %499 = vrot.lane.b32.xlu0 %v3658_v3, %s3591_s21  ;;  %v1205_v21 = vor.u32 %v1204_v12, %v1201_v11  ;;  %v1218_v24 = vrot.slane %v1216_v13, 5  ;;  %v1229_v25 = vrot.slane %v1227_v16, 5  ;;  %v1232_v26 = vrot.slane %v238_v15, 4  ;;  %v3699_v31 = vld [vmem:[%s3642_s20 + $0x20] sm:$0x1] }
  0x17   : > { %v1213_v27 = vor.u32 %v1212_v20, %v1209_v19  ;;  %v1221_v29 = vrot.slane %v226_v17, 4  ;;  %v1222_v30 = vshll.u32 %v3645_v0, 16  ;;  %v1238_v34 = vrot.slane %v1236_v22, 5  ;;  %v3714_v37 = vld [vmem:[%s3642_s20 + $0x28] sm:$0xf] }
  0x18   : > { %v1206_v28 = vrot.slane %v1205_v21, 4  ;;  %v1233_v33 = vor.u32 %v1232_v26, %v1229_v25  ;;  %v243_v35 = vshrl.u32 %v3685_v18, 16  ;;  %v1247_v36 = vshll.u32 %v3685_v18, 16  ;;  %v3718_v42 = vld [vmem:[%s3642_s20 + $0x24] sm:$0xf] }
  0x19   : > { %v1214_v38 = vrot.slane %v1213_v27, 4  ;;  %v1224_v40 = vrot.slane %v1222_v30, 5  ;;  %v231_v41 = vshrl.u32 %v3691_v23, 16  ;;  %v1256_v46 = vshll.u32 %v3699_v31, 16  ;;  %v3734_v51 = vld [vmem:[%s3642_s20 + $0x2c] sm:$0x1] }
  0x1a   : > { %507 = vrot.lane.b32.xlu1 %v3685_v18, %s3591_s21  ;;  %505 = vrot.lane.b32.xlu0 %v3691_v23, %s3591_s21  ;;  %v1234_v43 = vrot.slane %v1233_v33, 4  ;;  %v1249_v44 = vrot.slane %v1247_v36, 5  ;;  %v1252_v45 = vrot.slane %v243_v35, 4  ;;  %v3729_v48 = vsel %vm3703_vm2, %v1206_v28, %v1209_v19 }
  0x1b   : > { %v3725_v47 = vsel %vm3703_vm2, %v1214_v38, %v1218_v24  ;;  %v1225_v49 = vor.u32 %v1224_v40, %v1221_v29  ;;  %v1241_v50 = vrot.slane %v231_v41, 4  ;;  %v1242_v55 = vshll.u32 %v3691_v23, 16 }
  0x1c   : > { %v1295_v52 = vshrl.u32 %v3725_v47, 16  ;;  %v3739_v53 = vsel %vm3703_vm2, %v1234_v43, %v1238_v34  ;;  %v1253_v54 = vor.u32 %v1252_v45, %v1249_v44  ;;  %v244_v59 = vshrl.u32 %v3714_v37, 16 }
  0x1d   : > { %v1296_v56 = vshrl.u32 %v3739_v53, 16  ;;  %v1294_v57 = vpack.i.b16 %v3739_v53, %v3725_v47  ;;  %v1226_v58 = vrot.slane %v1225_v49, 4  ;;  %v1283_v60 = vshrl.u32 %v3729_v48, 16 }
  0x1e   : > { %511 = vrot.lane.b32.xlu1 %v3714_v37, %s3591_s21  ;;  %509 = vrot.lane.b32.xlu0 %v3718_v42, %s3591_s21  ;;  %v1244_v61 = vrot.slane %v1242_v55, 5  ;;  %v1267_v62 = vshll.u32 %v3714_v37, 16  ;;  %v1276_v63 = vshll.u32 %v3734_v51, 16  ;;  %v1272_v11 = vrot.slane %v244_v59, 4 }
  0x1f   : > { %v3753_v5 = vpack.i.b16 %v1296_v56, %v1295_v52  ;;  %v3757_v10 = vsel %vm3703_vm2, %v1226_v58, %v1229_v25  ;;  %v1254_v19 = vrot.slane %v1253_v54, 4  ;;  %v1258_v20 = vrot.slane %v1256_v46, 5 }
  0x20   : > { %v1284_v12 = vshrl.u32 %v3757_v10, 16  ;;  %v1282_v13 = vpack.i.b16 %v3757_v10, %v3729_v48  ;;  %v1245_v16 = vor.u32 %v1244_v61, %v1241_v50  ;;  %v1269_v21 = vrot.slane %v1267_v62, 5 }
  0x21   : > { %v232_v22 = vshrl.u32 %v3718_v42, 16  ;;  %v1278_v26 = vrot.slane %v1276_v63, 5  ;;  %v1262_v27 = vshll.u32 %v3718_v42, 16  ;;  %v2251_v30 = vrot.slane %v3658_v3, 5 }
  0x22   : > { %873 = vrot.lane.b32.xlu1 %v3658_v3, %s3592_s22  ;;  %871 = vrot.lane.b32.xlu0 %v3648_v1, %s3592_s22  ;;  %v3769_v24 = vpack.i.b16 %v1284_v12, %v1283_v60  ;;  %v1246_v25 = vrot.slane %v1245_v16, 4  ;;  %v1273_v28 = vor.u32 %v1272_v11, %v1269_v21  ;;  %v2254_v33 = vrot.slane %v3667_v8, 5 }
  0x23   : > { %v1261_v29 = vrot.slane %v232_v22, 4  ;;  %v3593_v34 = vmov 1983009808   ;;  %v1264_v38 = vrot.slane %v1262_v27, 5  ;;  %v3431_v43 = vrot.slane %v3648_v1, 9 }
  0x24   : > { %v3776_v36 = vunpack.c.l.s4 %v3593_v34  ;;  %v2258_v45 = vrot.slane %v3655_v2, 5  ;;  %v3792_v8 = vsel %vm3703_vm2, %v1254_v19, %v1258_v20  ;;  %v1274_v46 = vrot.slane %v1273_v28, 4 }
  0x25   : > { %v2253_v49 = vrot.slane %v2251_v30, 4  ;;  %v2261_v50 = vrot.slane %v3675_v14, 5  ;;  %v1301_v52 = vshrl.u32 %v3792_v8, 16  ;;  %v1265_v54 = vor.u32 %v1264_v38, %v1261_v29 }
  0x26   : > { %877 = vrot.lane.b32.xlu1 %v3655_v2, %s3592_s22  ;;  %875 = vrot.lane.b32.xlu0 %v3645_v0, %s3592_s22  ;;  %v2260_v55 = vrot.slane %v2258_v45, 4  ;;  %v3432_v56 = vrot.slane %v3645_v0, 9  ;;  %v3799_v58 = vsel %vm3703_vm2, %v1246_v25, %v1249_v44  ;;  %v3803_v60 = vsel %vm3703_vm2, %v1274_v46, %v1278_v26 }
  0x27   : > { %v3807_v61 = vsel %vm3780_vm5, %v2253_v49, %v2254_v33  ;;  %v3811_v14 = vsel %vm3780_vm5, %v3431_v43, %v2251_v30  ;;  %v1300_v62 = vpack.i.b16 %v3803_v60, %v3792_v8  ;;  %v1302_v63 = vshrl.u32 %v3803_v60, 16 }
  0x28   : > { %v1266_v11 = vrot.slane %v1265_v54, 4  ;;  %v2265_v44 = vrot.slane %v3685_v18, 5  ;;  %v1289_v12 = vshrl.u32 %v3799_v58, 16  ;;  %v2292_v16 = vshrl.u32 %v3807_v61, 16 }
  0x29   : > { %v2280_v19 = vshrl.u32 %v3811_v14, 16  ;;  %v3826_v20 = vsel %vm3780_vm5, %v2260_v55, %v2261_v50  ;;  %v3828_v25 = vpack.i.b16 %v1302_v63, %v1301_v52  ;;  %v3838_v28 = vsel %vm3780_vm5, %v3432_v56, %v2258_v45 }
  0x2a   : > { %881 = vrot.lane.b32.xlu1 %v3685_v18, %s3592_s22  ;;  %879 = vrot.lane.b32.xlu0 %v3691_v23, %s3592_s22  ;;  %v3832_v26 = vsel %vm3703_vm2, %v1266_v11, %v1269_v21  ;;  %v2293_v33 = vshrl.u32 %v3826_v20, 16  ;;  %v2281_v32 = vshrl.u32 %v3838_v28, 16  ;;  %v2267_v21 = vrot.slane %v2265_v44, 4 }
  0x2b   : > { %v1288_v29 = vpack.i.b16 %v3832_v26, %v3799_v58  ;;  %v1290_v30 = vshrl.u32 %v3832_v26, 16  ;;  %v2268_v38 = vrot.slane %v3699_v31, 5  ;;  %v3433_v43 = vrot.slane %v3691_v23, 9 }
  0x2c   : > { %v3855_v46 = vpack.i.b16 %v2293_v33, %v2292_v16  ;;  %v3857_v49 = vpack.i.b16 %v2281_v32, %v2280_v19  ;;  %v2272_v50 = vrot.slane %v3714_v37, 5  ;;  %v3861_v52 = vshrl.u32 %v250_v39, 7 }
  0x2d   : > { %v3853_v45 = vpack.i.b16 %v1290_v30, %v1289_v12  ;;  %v3865_v31 = vsel %vm3780_vm5, %v3433_v43, %v2265_v44  ;;  %v2275_v54 = vrot.slane %v3734_v51, 5  ;;  %v3434_v55 = vrot.slane %v3718_v42, 9 }
  0x2e   : > { %885 = vrot.lane.b32.xlu1 %v3714_v37, %s3592_s22  ;;  %883 = vrot.lane.b32.xlu0 %v3718_v42, %s3592_s22  ;;  %v249_v56 = vunpack.c.0.s8 %v3776_v36  ;;  %v3872_v63 = vsel %vm3780_vm5, %v2267_v21, %v2268_v38  ;;  %v2286_v11 = vshrl.u32 %v3865_v31, 16  ;;  %v2274_v12 = vrot.slane %v2272_v50, 4 }
  0x2f   : > { %v2298_v39 = vshrl.u32 %v3872_v63, 16  ;;  %v3882_v51 = vsel %vm3780_vm5, %v3434_v55, %v2272_v50  ;;  %v242_v40 = vpack.i.b16 %v3714_v37, %v3685_v18  ;;  %v230_v50 = vpack.i.b16 %v3718_v42, %v3691_v23 }
  0x30   : > { %v3886_v36 = vsel %vm3780_vm5, %v2274_v12, %v2275_v54  ;;  %v2287_v16 = vshrl.u32 %v3882_v51, 16  ;;  %v3895_v33 = vsub.s32 %v249_v56, %v3861_v52  ;;  %v227_v2 = vpack.i.b16 %v226_v17, %v225_v4 }
  0x31   : > { %v2299_v30 = vshrl.u32 %v3886_v36, 16  ;;  %v233_v1 = vpack.i.b16 %v232_v22, %v231_v41  ;;  %v3594_v18 = vmov 1934713408  }
  0x32   : > { %1592 = vrot.lane.b32.xlu1 %v3725_v47, %s3591_s21  ;;  %1590 = vrot.lane.b32.xlu0 %v3729_v48, %s3591_s21  ;;  %v3897_v32 = vpack.i.b16 %v2287_v16, %v2286_v11  ;;  %v3911_v38 = vrot.slane %v236_v7, %v3895_v33  ;;  %v3914_v43 = vrot.slane %v242_v40, %v3895_v33  ;;  %v265_v23 = vunpack.c.l.s4 %v3594_v18 }
  0x33   : > { %v3905_v21 = vpack.i.b16 %v2299_v30, %v2298_v39  ;;  %v3922_v54 = vrot.slane %v224_v6, %v3895_v33  ;;  %v239_v7 = vpack.i.b16 %v238_v15, %v237_v9  ;;  %v245_v6 = vpack.i.b16 %v244_v59, %v243_v35 }
  0x34   : > { %v330_v55 = vcombine.low %v3911_v38, %v3914_v43  ;;  %v3941_v11 = vrot.slane %v230_v50, %v3895_v33  ;;  %v3972_v4 = vrot.slane %v227_v2, %v3895_v33  ;;  %v3975_v15 = vrot.slane %v233_v1, %v3895_v33 }
  0x35   : > { %v3956_v3 = vrot.slane %v239_v7, %v3895_v33  ;;  %v3959_v9 = vrot.slane %v245_v6, %v3895_v33  ;;  %v4011_v35 = vrot.slane %v1294_v57, %v3895_v33  ;;  %v4017_v37 = vrot.slane %v1300_v62, %v3895_v33 }
  0x36   : > { %1596 = vrot.lane.b32.xlu1 %v3739_v53, %s3591_s21  ;;  %1594 = vrot.lane.b32.xlu0 %v3757_v10, %s3591_s21  ;;  %v262_v12 = vcombine.low %v3922_v54, %v3941_v11  ;;  %v4021_v41 = vrot.slane %v3753_v5, %v3895_v33  ;;  %v4025_v42 = vrot.slane %v3828_v25, %v3895_v33  ;;  %v266_v59 = vunpack.c.0.s8 %v265_v23 }
  0x37   : > { %v4043_v57 = vrot.slane %v1288_v29, %v3895_v33  ;;  %v4047_v5 = vrot.slane %v3769_v24, %v3895_v33  ;;  %v4051_v22 = vrot.slane %v3853_v45, %v3895_v33 }
  0x39   : > { %5176 = vst [vmem:[#allocation3_spill] sm:$0xff] %v4043_v57 }
  0x3a   : > { %1600 = vrot.lane.b32.xlu1 %v3792_v8, %s3591_s21  ;;  %1598 = vrot.lane.b32.xlu0 %v3799_v58, %s3591_s21 }
  0x3e   : > { %1604 = vrot.lane.b32.xlu1 %v3803_v60, %s3591_s21  ;;  %1602 = vrot.lane.b32.xlu0 %v3832_v26, %s3591_s21 }
  0x42   : > { %1918 = vrot.lane.b32.xlu1 %v3725_v47, %s3592_s22  ;;  %1916 = vrot.lane.b32.xlu0 %v3729_v48, %s3592_s22  ;;  %v4056_v48 = vsub.s32 %v266_v59, %v3861_v52 }
  0x44   : > { %v4084_v29 = vrot.slane %v330_v55, %v4056_v48  ;;  %v4087_v45 = vrot.slane %v262_v12, %v4056_v48 }
  0x46   : > { %1922 = vrot.lane.b32.xlu1 %v3739_v53, %s3592_s22  ;;  %1920 = vrot.lane.b32.xlu0 %v3757_v10, %s3592_s22  ;;  %v4037_v53 = vrot.slane %v1282_v13, %v3895_v33  ;;  %v364_v10 = vcombine.low %v3956_v3, %v3959_v9  ;;  %v296_v13 = vcombine.low %v3972_v4, %v3975_v15 }
  0x47   : > { %5177 = vst [vmem:[#allocation4_spill] sm:$0xff] %v4084_v29  ;;  %5178 = vst [vmem:[#allocation5_spill] sm:$0xff] %v4087_v45  ;;  %v3490_v16 = vcombine.high %v4084_v29, %v4084_v29  ;;  %v3486_v30 = vcombine.high %v4087_v45, %v4087_v45 }
  0x48   : > { %5175 = vst [vmem:[#allocation2_spill] sm:$0xff] %v4037_v53  ;;  %v304_v62 = vrot.slane %v296_v13, %v4056_v48 }
  0x4a   : > { %1926 = vrot.lane.b32.xlu1 %v3792_v8, %s3592_s22  ;;  %1924 = vrot.lane.b32.xlu0 %v3799_v58, %s3592_s22  ;;  %v3487_v55 = vcombine.high %v304_v62, %v304_v62 }
  0x4e   : > { %1930 = vrot.lane.b32.xlu1 %v3803_v60, %s3592_s22  ;;  %1928 = vrot.lane.b32.xlu0 %v3832_v26, %s3592_s22  ;;  %v372_v60 = vrot.slane %v364_v10, %v4056_v48  ;;  %v3335_v26 = vcombine.low %v304_v62, %v304_v62 }
  0x50   : > { %v3342_v25 = vcombine.low %v372_v60, %v372_v60  ;;  %v3491_v50 = vcombine.high %v372_v60, %v372_v60 }
  0x52   : > { %2589 = vrot.lane.b32.xlu1 %v3807_v61, %s3591_s21  ;;  %2587 = vrot.lane.b32.xlu0 %v3811_v14, %s3591_s21 }
  0x56   : > { %2593 = vrot.lane.b32.xlu1 %v3826_v20, %s3591_s21  ;;  %2591 = vrot.lane.b32.xlu0 %v3838_v28, %s3591_s21 }
  0x5a   : > { %2597 = vrot.lane.b32.xlu1 %v3872_v63, %s3591_s21  ;;  %2595 = vrot.lane.b32.xlu0 %v3865_v31, %s3591_s21 }
  0x5e   : > { %2601 = vrot.lane.b32.xlu1 %v3886_v36, %s3591_s21  ;;  %2599 = vrot.lane.b32.xlu0 %v3882_v51, %s3591_s21 }
  0x62   : > { %2915 = vrot.lane.b32.xlu1 %v3807_v61, %s3592_s22  ;;  %2913 = vrot.lane.b32.xlu0 %v3811_v14, %s3592_s22 }
  0x66   : > { %2919 = vrot.lane.b32.xlu1 %v3826_v20, %s3592_s22  ;;  %2917 = vrot.lane.b32.xlu0 %v3838_v28, %s3592_s22 }
  0x6a   : > { %2923 = vrot.lane.b32.xlu1 %v3872_v63, %s3592_s22  ;;  %2921 = vrot.lane.b32.xlu0 %v3865_v31, %s3592_s22 }
  0x6e   : > { %2927 = vrot.lane.b32.xlu1 %v3886_v36, %s3592_s22  ;;  %2925 = vrot.lane.b32.xlu0 %v3882_v51, %s3592_s22 }
  0x72   : > { %420 = vrot.lane.b32.xlu1 %v3342_v25, %s3595_s23  ;;  %385 = vrot.lane.b32.xlu0 %v3335_v26, %s3595_s23 }
  0x76   : > { %425 = vrot.lane.b32.xlu1 %v3490_v16, %s3596_s24  ;;  %390 = vrot.lane.b32.xlu0 %v3486_v30, %s3596_s24 }
  0x7a   : > { %430 = vrot.lane.b32.xlu1 %v3491_v50, %s3597_s25  ;;  %395 = vrot.lane.b32.xlu0 %v3487_v55, %s3597_s25 }
  0x84   : > { %v502_v12 = vpop.permute.xlu1 %501  ;;  %v498_v2 = vpop.permute.xlu0 %497 }
  0x85   : > { %v515_v10 = vpack.i.b16 %v502_v12, %v498_v2  ;;  %v517_v24 = vshrl.u32 %v502_v12, 16  ;;  %v516_v47 = vshrl.u32 %v498_v2, 16 }
  0x87   : > { %v544_v50 = vrot.slane %v515_v10, %v3895_v33 }
  0x88   : > { %v504_v1 = vpop.permute.xlu1 %503  ;;  %v500_v18 = vpop.permute.xlu0 %499 }
  0x89   : > { %v527_v13 = vpack.i.b16 %v504_v1, %v500_v18  ;;  %v529_v55 = vshrl.u32 %v504_v1, 16  ;;  %v528_v7 = vshrl.u32 %v500_v18, 16 }
  0x8b   : > { %v612_v6 = vrot.slane %v527_v13, %v3895_v33  ;;  %v530_v0 = vpack.i.b16 %v529_v55, %v528_v7  ;;  %v518_v13 = vpack.i.b16 %v517_v24, %v516_v47 }
  0x8c   : > { %v508_v23 = vpop.permute.xlu1 %507  ;;  %v506_v59 = vpop.permute.xlu0 %505 }
  0x8d   : > { %v534_v40 = vshrl.u32 %v508_v23, 16  ;;  %v522_v52 = vshrl.u32 %v506_v59, 16  ;;  %v646_v47 = vrot.slane %v530_v0, %v3895_v33  ;;  %v578_v24 = vrot.slane %v518_v13, %v3895_v33 }
  0x90   : > { %v512_v60 = vpop.permute.xlu1 %511  ;;  %v510_v62 = vpop.permute.xlu0 %509 }
  0x91   : > { %v533_v25 = vpack.i.b16 %v512_v60, %v508_v23  ;;  %v535_v26 = vshrl.u32 %v512_v60, 16  ;;  %v521_v16 = vpack.i.b16 %v510_v62, %v506_v59  ;;  %v523_v30 = vshrl.u32 %v510_v62, 16 }
  0x93   : > { %v620_v58 = vrot.slane %v533_v25, %v3895_v33  ;;  %v552_v8 = vrot.slane %v521_v16, %v3895_v33  ;;  %v536_v60 = vpack.i.b16 %v535_v26, %v534_v40  ;;  %v524_v17 = vpack.i.b16 %v523_v30, %v522_v52 }
  0x94   : > { %v4111_v44 = vpop.permute.xlu1 %873  ;;  %v4113_v34 = vpop.permute.xlu0 %871 }
  0x95   : > { %v621_v62 = vcombine.low %v612_v6, %v620_v58  ;;  %v553_v10 = vcombine.low %v544_v50, %v552_v8  ;;  %v622_v1 = vcombine.high %v612_v6, %v620_v58  ;;  %v554_v18 = vcombine.high %v544_v50, %v552_v8 }
  0x96   : > { %v654_v25 = vrot.slane %v536_v60, %v3895_v33  ;;  %v586_v40 = vrot.slane %v524_v17, %v3895_v33 }
  0x97   : > { %v4116_v23 = vrot.slane %v621_v62, %v4056_v48  ;;  %v4119_v59 = vrot.slane %v553_v10, %v4056_v48  ;;  %v636_v52 = vrot.slane %v622_v1, %v4056_v48  ;;  %v568_v7 = vrot.slane %v554_v18, %v4056_v48 }
  0x98   : > { %v4121_v12 = vpop.permute.xlu1 %877  ;;  %v4123_v2 = vpop.permute.xlu0 %875  ;;  %v655_v26 = vcombine.low %v646_v47, %v654_v25  ;;  %v587_v50 = vcombine.low %v578_v24, %v586_v40  ;;  %v588_v19 = vcombine.high %v578_v24, %v586_v40  ;;  %v4191_v24 = vrot.slane %v3897_v32, %v3895_v33 }
  0x99   : > { %5179 = vst [vmem:[#allocation6_spill] sm:$0xff] %v4116_v23  ;;  %5180 = vst [vmem:[#allocation7_spill] sm:$0xff] %v4119_v59  ;;  %v3498_v58 = vcombine.high %v4116_v23, %v4116_v23  ;;  %v3494_v8 = vcombine.high %v4119_v59, %v4119_v59  ;;  %v3359_v16 = vcombine.low %v636_v52, %v636_v52  ;;  %v903_v39 = vshrl.u32 %v4121_v12, 16 }
  0x9a   : > { %v3352_v30 = vcombine.low %v568_v7, %v568_v7  ;;  %v3500_v62 = vcombine.high %v636_v52, %v636_v52  ;;  %v3496_v10 = vcombine.high %v568_v7, %v568_v7  ;;  %v663_v1 = vrot.slane %v655_v26, %v4056_v48 }
  0x9b   : > { %716 = vrot.lane.b32.xlu1 %v3498_v58, %s3596_s24  ;;  %681 = vrot.lane.b32.xlu0 %v3494_v8, %s3596_s24  ;;  %v595_v8 = vrot.slane %v587_v50, %v4056_v48  ;;  %v891_v56 = vshrl.u32 %v4123_v2, 16  ;;  %v656_v26 = vcombine.high %v646_v47, %v654_v25 }
  0x9c   : > { %v4137_v6 = vpop.permute.xlu1 %881  ;;  %v4139_v17 = vpop.permute.xlu0 %879  ;;  %v3356_v45 = vcombine.low %v663_v1, %v663_v1 }
  0x9d   : > { %v908_v60 = vshrl.u32 %v4137_v6, 16  ;;  %v896_v18 = vshrl.u32 %v4139_v17, 16  ;;  %v3349_v29 = vcombine.low %v595_v8, %v595_v8  ;;  %v670_v53 = vrot.slane %v656_v26, %v4056_v48 }
  0x9e   : > { %v3495_v47 = vcombine.high %v595_v8, %v595_v8 }
  0x9f   : > { %726 = vrot.lane.b32.xlu1 %v3359_v16, %s3598_s26  ;;  %691 = vrot.lane.b32.xlu0 %v3352_v30, %s3598_s26  ;;  %v902_v16 = vshrl.u32 %v4111_v44, 16  ;;  %v890_v30 = vshrl.u32 %v4113_v34, 16 }
  0xa0   : > { %v4143_v0 = vpop.permute.xlu1 %885  ;;  %v4145_v55 = vpop.permute.xlu0 %883 }
  0xa1   : > { %v909_v13 = vshrl.u32 %v4143_v0, 16  ;;  %v897_v58 = vshrl.u32 %v4145_v55, 16  ;;  %v904_v59 = vpack.i.b16 %v903_v39, %v902_v16  ;;  %v892_v23 = vpack.i.b16 %v891_v56, %v890_v30 }
  0xa2   : > { %v602_v56 = vrot.slane %v588_v19, %v4056_v48  ;;  %v4179_v39 = vrot.slane %v3855_v46, %v3895_v33  ;;  %v5183_v30 = vcombine.high %v3911_v38, %v3914_v43 }
  0xa3   : > { %736 = vrot.lane.b32.xlu1 %v3500_v62, %s3599_s27  ;;  %701 = vrot.lane.b32.xlu0 %v3496_v10, %s3599_s27  ;;  %v910_v50 = vpack.i.b16 %v909_v13, %v908_v60  ;;  %v898_v27 = vpack.i.b16 %v897_v58, %v896_v18  ;;  %v3499_v10 = vcombine.high %v663_v1, %v663_v1 }
  0xa4   : > { %v4159_v52 = vpop.permute.xlu1 %1592  ;;  %v4161_v7 = vpop.permute.xlu0 %1590  ;;  %v4197_v19 = vrot.slane %v892_v23, %v3895_v33  ;;  %v907_v60 = vpack.i.b16 %v4143_v0, %v4137_v6  ;;  %v3360_v1 = vcombine.low %v670_v53, %v670_v53  ;;  %v895_v18 = vpack.i.b16 %v4145_v55, %v4139_v17 }
  0xa5   : > { %v4171_v25 = vrot.slane %v910_v50, %v3895_v33  ;;  %v4174_v40 = vrot.slane %v898_v27, %v3895_v33  ;;  %v4194_v27 = vrot.slane %v904_v59, %v3895_v33  ;;  %v5182_v59 = vpack.i.b16 %v3886_v36, %v3872_v63 }
  0xa6   : > { %v3353_v13 = vcombine.low %v602_v56, %v602_v56  ;;  %v901_v63 = vpack.i.b16 %v4121_v12, %v4111_v44  ;;  %v889_v36 = vpack.i.b16 %v4123_v2, %v4113_v34  ;;  %v994_v17 = vrot.slane %v907_v60, %v3895_v33 }
  0xa7   : > { %711 = vrot.lane.b32.xlu1 %v3356_v45, %s3595_s23  ;;  %676 = vrot.lane.b32.xlu0 %v3349_v29, %s3595_s23  ;;  %v4183_v29 = vrot.slane %v3857_v49, %v3895_v33  ;;  %v4187_v45 = vrot.slane %v3905_v21, %v3895_v33  ;;  %v5181_v21 = vpack.i.b16 %v3826_v20, %v3807_v61 }
  0xa8   : > { %v4165_v57 = vpop.permute.xlu1 %1596  ;;  %v4167_v62 = vpop.permute.xlu0 %1594  ;;  %v4215_v23 = vrot.slane %v5182_v59, %v3895_v33  ;;  %v1029_v58 = vcombine.low %v4194_v27, %v4171_v25  ;;  %v961_v61 = vcombine.low %v4197_v19, %v4174_v40  ;;  %v3501_v0 = vcombine.high %v670_v53, %v670_v53 }
  0xa9   : > { %v4209_v32 = vrot.slane %v5181_v21, %v3895_v33  ;;  %v3497_v55 = vcombine.high %v602_v56, %v602_v56  ;;  %v926_v8 = vrot.slane %v895_v18, %v3895_v33  ;;  %v345_v26 = vrot.slane %v5183_v30, %v4056_v48 }
  0xaa   : > { %v1037_v16 = vrot.slane %v1029_v58, %v4056_v48  ;;  %v969_v44 = vrot.slane %v961_v61, %v4056_v48  ;;  %v986_v53 = vrot.slane %v901_v63, %v3895_v33  ;;  %v918_v50 = vrot.slane %v889_v36, %v3895_v33 }
  0xab   : > { %721 = vrot.lane.b32.xlu1 %v3499_v10, %s3597_s25  ;;  %686 = vrot.lane.b32.xlu0 %v3495_v47, %s3597_s25  ;;  %v5184_v10 = vcombine.high %v3922_v54, %v3941_v11  ;;  %v3345_v38 = vcombine.low %v345_v26, %v345_v26  ;;  %v5187_v11 = vcombine.high %v3956_v3, %v3959_v9 }
  0xac   : > { %v4201_v46 = vpop.permute.xlu1 %1600  ;;  %v4203_v49 = vpop.permute.xlu0 %1598  ;;  %v995_v56 = vcombine.low %v986_v53, %v994_v17  ;;  %v927_v21 = vcombine.low %v918_v50, %v926_v8  ;;  %v3374_v59 = vcombine.low %v1037_v16, %v1037_v16  ;;  %v3367_v60 = vcombine.low %v969_v44, %v969_v44 }
  0xad   : > { %v277_v47 = vrot.slane %v5184_v10, %v4056_v48  ;;  %v379_v58 = vrot.slane %v5187_v11, %v4056_v48  ;;  %v5188_v61 = vcombine.high %v3972_v4, %v3975_v15  ;;  %v5189_v3 = vpack.i.b16 %v3838_v28, %v3811_v14 }
  0xae   : > { %v4267_v54 = vrot.slane %v927_v21, %v4056_v48  ;;  %v5190_v4 = vpack.i.b16 %v3882_v51, %v3865_v31  ;;  %v996_v31 = vcombine.high %v986_v53, %v994_v17  ;;  %v928_v51 = vcombine.high %v918_v50, %v926_v8 }
  0xaf   : > { %731 = vrot.lane.b32.xlu1 %v3360_v1, %s3600_s28  ;;  %696 = vrot.lane.b32.xlu0 %v3353_v13, %s3600_s28  ;;  %v3338_v43 = vcombine.low %v277_v47, %v277_v47  ;;  %v4264_v13 = vrot.slane %v995_v56, %v4056_v48  ;;  %v311_v63 = vrot.slane %v5188_v61, %v4056_v48 }
  0xb0   : > { %v4239_v12 = vpop.permute.xlu1 %1604  ;;  %v4241_v34 = vpop.permute.xlu0 %1602  ;;  %5186 = vst [vmem:[#allocation9_spill] sm:$0xff] %v4267_v54  ;;  %v4291_v9 = vrot.slane %v5189_v3, %v3895_v33  ;;  %v4297_v15 = vrot.slane %v5190_v4, %v3895_v33  ;;  %v3346_v10 = vcombine.low %v379_v58, %v379_v58  ;;  %v1010_v11 = vrot.slane %v996_v31, %v4056_v48 }
  0xb1   : > { %5185 = vst [vmem:[#allocation8_spill] sm:$0xff] %v4264_v13  ;;  %v3506_v36 = vcombine.high %v4264_v13, %v4264_v13  ;;  %v3339_v56 = vcombine.low %v311_v63, %v311_v63  ;;  %v942_v61 = vrot.slane %v928_v51, %v4056_v48  ;;  %v3493_v53 = vcombine.high %v379_v58, %v379_v58 }
  0xb2   : > { %v3377_v17 = vcombine.low %v1010_v11, %v1010_v11  ;;  %v3489_v50 = vcombine.high %v311_v63, %v311_v63  ;;  %v1609_v31 = vshrl.u32 %v4161_v7, 16  ;;  %v1622_v51 = vshrl.u32 %v4165_v57, 16 }
  0xb3   : > { %741 = vrot.lane.b32.xlu1 %v3501_v0, %s3601_s29  ;;  %706 = vrot.lane.b32.xlu0 %v3497_v55, %s3601_s29  ;;  %v3502_v0 = vcombine.high %v4267_v54, %v4267_v54  ;;  %v3370_v8 = vcombine.low %v942_v61, %v942_v61 }
  0xb4   : > { %v4259_v1 = vpop.permute.xlu1 %1918  ;;  %v4261_v18 = vpop.permute.xlu0 %1916 }
  0xb7   : > { %1085 = vrot.lane.b32.xlu1 %v3374_v59, %s3595_s23  ;;  %1050 = vrot.lane.b32.xlu0 %v3367_v60, %s3595_s23  ;;  %v3507_v59 = vcombine.high %v1037_v16, %v1037_v16  ;;  %v3503_v60 = vcombine.high %v969_v44, %v969_v44  ;;  %v1030_v16 = vcombine.high %v4194_v27, %v4171_v25  ;;  %v5162_v27 = vmov 0  }
  0xb8   : > { %v4283_v55 = vpop.permute.xlu1 %1922  ;;  %v4285_v30 = vpop.permute.xlu0 %1920  ;;  %v962_v44 = vcombine.high %v4197_v19, %v4174_v40  ;;  %814 = vmatprep.mubr.bf16.mxu0 %v5162_v27  ;;  %862 = vmatprep.mubr.bf16.mxu1 %v5162_v27 }
  0xb9   : > { %v1044_v4 = vrot.slane %v1030_v16, %v4056_v48  ;;  %3579 = vset.pattern.permute.xlu0 %v5162_v27  ;;  %3580 = vset.pattern.permute.xlu1 %v5162_v27  ;;  %v1616_v16 = vshrl.u32 %v4241_v34, 16 }
  0xba   : > { %v976_v25 = vrot.slane %v962_v44, %v4056_v48  ;;  %v3504_v44 = vcombine.high %v942_v61, %v942_v61  ;;  %v5192_v61 = vcombine.low %v4047_v5, %v4051_v22 }
  0xbb   : > { %435 = vrot.lane.b32.xlu1 %v3345_v38, %s3598_s26  ;;  %400 = vrot.lane.b32.xlu0 %v3338_v43, %s3598_s26  ;;  %v3492_v38 = vcombine.high %v345_v26, %v345_v26  ;;  %v3488_v43 = vcombine.high %v277_v47, %v277_v47  ;;  %v3378_v19 = vcombine.low %v1044_v4, %v1044_v4 }
  0xbc   : > { %v4303_v21 = vpop.permute.xlu1 %1926  ;;  %v4305_v14 = vpop.permute.xlu0 %1924  ;;  %v3371_v58 = vcombine.low %v976_v25, %v976_v25  ;;  %v3509_v28 = vcombine.high %v1044_v4, %v1044_v4  ;;  %v3505_v2 = vcombine.high %v976_v25, %v976_v25 }
  0xbf   : > { %1090 = vrot.lane.b32.xlu1 %v3506_v36, %s3596_s24  ;;  %1055 = vrot.lane.b32.xlu0 %v3502_v0, %s3596_s24 }
  0xc0   : > { %v4313_v36 = vpop.permute.xlu1 %1930  ;;  %v4315_v0 = vpop.permute.xlu0 %1928 }
  0xc3   : > { %440 = vrot.lane.b32.xlu1 %v3346_v10, %s3600_s28  ;;  %405 = vrot.lane.b32.xlu0 %v3339_v56, %s3600_s28  ;;  %v1621_v56 = vshrl.u32 %v4159_v52, 16 }
  0xc4   : > { %v4327_v47 = vpop.permute.xlu1 %2589  ;;  %v4329_v3 = vpop.permute.xlu0 %2587 }
  0xc5   : > { %v1623_v40 = vpack.i.b16 %v1622_v51, %v1621_v56  ;;  %v5196_v56 = vld [vmem:[#allocation3_spill] sm:$0xff] }
  0xc7   : > { %1095 = vrot.lane.b32.xlu1 %v3507_v59, %s3597_s25  ;;  %1060 = vrot.lane.b32.xlu0 %v3503_v60, %s3597_s25  ;;  %v1610_v60 = vshrl.u32 %v4167_v62, 16  ;;  %v1362_v59 = vrot.slane %v5192_v61, %v4056_v48  ;;  %v5195_v61 = vld [vmem:[#allocation2_spill] sm:$0xff]  ;;  %v4388_v4 = vrot.slane %v1623_v40, %v3895_v33 }
  0xc8   : > { %v4338_v63 = vpop.permute.xlu1 %2593  ;;  %v4340_v10 = vpop.permute.xlu0 %2591 }
  0xcb   : > { %445 = vrot.lane.b32.xlu1 %v3492_v38, %s3599_s27  ;;  %410 = vrot.lane.b32.xlu0 %v3488_v43, %s3599_s27  ;;  %v1627_v38 = vshrl.u32 %v4201_v46, 16  ;;  %v1615_v43 = vshrl.u32 %v4203_v49, 16 }
  0xcd   : > { %v1617_v27 = vpack.i.b16 %v1616_v16, %v1615_v43  ;;  %v1614_v16 = vpack.i.b16 %v4241_v34, %v4203_v49 }
  0xcf   : > { %1100 = vrot.lane.b32.xlu1 %v3377_v17, %s3598_s26  ;;  %1065 = vrot.lane.b32.xlu0 %v3370_v8, %s3598_s26  ;;  %v3508_v17 = vcombine.high %v1010_v11, %v1010_v11  ;;  %v1628_v8 = vshrl.u32 %v4239_v12, 16  ;;  %v4367_v11 = vpop.permute.xlu0 %2595  ;;  %v4397_v25 = vrot.slane %v1617_v27, %v3895_v33  ;;  %v1608_v27 = vpack.i.b16 %v4167_v62, %v4161_v7 }
  0xd0   : > { %v1645_v49 = vrot.slane %v1614_v16, %v3895_v33 }
  0xd1   : > { %v1629_v26 = vpack.i.b16 %v1628_v8, %v1627_v38  ;;  %v1626_v8 = vpack.i.b16 %v4239_v12, %v4201_v46  ;;  %v1637_v62 = vrot.slane %v1608_v27, %v3895_v33 }
  0xd3   : > { %450 = vrot.lane.b32.xlu1 %v3493_v53, %s3601_s29  ;;  %415 = vrot.lane.b32.xlu0 %v3489_v50, %s3601_s29  ;;  %v5191_v50 = vcombine.low %v4021_v41, %v4025_v42  ;;  %v1611_v53 = vpack.i.b16 %v1610_v60, %v1609_v31  ;;  %v5197_v31 = vcombine.low %v5195_v61, %v5196_v56  ;;  %v4401_v38 = vpop.permute.xlu0 %2599 }
  0xd4   : > { %v1713_v46 = vrot.slane %v1626_v8, %v3895_v33 }
  0xd5   : > { %v4385_v51 = vrot.slane %v5197_v31, %v4056_v48  ;;  %v5200_v31 = vcombine.high %v5195_v61, %v5196_v56 }
  0xd7   : > { %1105 = vrot.lane.b32.xlu1 %v3378_v19, %s3600_s28  ;;  %1070 = vrot.lane.b32.xlu0 %v3371_v58, %s3600_s28  ;;  %v1430_v19 = vrot.slane %v5191_v50, %v4056_v48  ;;  %v4365_v58 = vpop.permute.xlu1 %2597  ;;  %5198 = vst [vmem:[#allocation2_spill] sm:$0xff] %v4385_v51  ;;  %v3510_v43 = vcombine.high %v4385_v51, %v4385_v51 }
  0xd9   : > { %v3390_v50 = vcombine.low %v1430_v19, %v1430_v19 }
  0xdb   : > { %1110 = vrot.lane.b32.xlu1 %v3508_v17, %s3599_s27  ;;  %1075 = vrot.lane.b32.xlu0 %v3504_v44, %s3599_s27  ;;  %v3383_v17 = vcombine.low %v1362_v59, %v1362_v59  ;;  %v5193_v44 = vcombine.low %v4011_v35, %v4017_v37  ;;  %v4399_v60 = vpop.permute.xlu1 %2601 }
  0xdd   : > { %v4379_v6 = vrot.slane %v5193_v44, %v4056_v48  ;;  %v4423_v44 = vpop.permute.xlu0 %2913 }
  0xdf   : > { %1115 = vrot.lane.b32.xlu1 %v3509_v28, %s3601_s29  ;;  %1080 = vrot.lane.b32.xlu0 %v3505_v2, %s3601_s29  ;;  %5194 = vst [vmem:[#allocation10_spill] sm:$0xff] %v4379_v6  ;;  %v4391_v28 = vrot.slane %v1611_v53, %v3895_v33  ;;  %v4394_v2 = vrot.slane %v1629_v26, %v3895_v33 }
  0xe0   : > { %v3514_v40 = vcombine.high %v4379_v6, %v4379_v6  ;;  %v1620_v26 = vpack.i.b16 %v4165_v57, %v4159_v52  ;;  %v3515_v57 = vcombine.high %v1430_v19, %v1430_v19  ;;  %v3511_v52 = vcombine.high %v1362_v59, %v1362_v59 }
  0xe1   : > { %v1748_v53 = vcombine.low %v4388_v4, %v4394_v2  ;;  %v5199_v59 = vcombine.high %v4011_v35, %v4017_v37  ;;  %v4445_v8 = vpop.permute.xlu0 %2917 }
  0xe2   : > { %v1705_v7 = vrot.slane %v1620_v26, %v3895_v33  ;;  %v1646_v26 = vcombine.low %v1637_v62, %v1645_v49 }
  0xe3   : > { %1478 = vrot.lane.b32.xlu1 %v3390_v50, %s3595_s23  ;;  %1443 = vrot.lane.b32.xlu0 %v3383_v17, %s3595_s23  ;;  %v1680_v50 = vcombine.low %v4391_v28, %v4397_v25  ;;  %v4421_v17 = vpop.permute.xlu1 %2915  ;;  %v1756_v12 = vrot.slane %v1748_v53, %v4056_v48  ;;  %v1403_v19 = vrot.slane %v5199_v59, %v4056_v48 }
  0xe4   : > { %v4453_v61 = vrot.slane %v1646_v26, %v4056_v48 }
  0xe5   : > { %v1688_v34 = vrot.slane %v1680_v50, %v4056_v48  ;;  %v3406_v16 = vcombine.low %v1756_v12, %v1756_v12  ;;  %v3393_v50 = vcombine.low %v1403_v19, %v1403_v19 }
  0xe6   : > { %5202 = vst [vmem:[#allocation11_spill] sm:$0xff] %v4453_v61 }
  0xe7   : > { %1483 = vrot.lane.b32.xlu1 %v3514_v40, %s3596_s24  ;;  %1448 = vrot.lane.b32.xlu0 %v3510_v43, %s3596_s24  ;;  %v1335_v40 = vrot.slane %v5200_v31, %v4056_v48  ;;  %v1714_v43 = vcombine.low %v1705_v7, %v1713_v46  ;;  %v4443_v27 = vpop.permute.xlu1 %2919  ;;  %v3399_v53 = vcombine.low %v1688_v34, %v1688_v34 }
  0xe8   : > { %v5204_v31 = vcombine.high %v4047_v5, %v4051_v22  ;;  %v1647_v5 = vcombine.high %v1637_v62, %v1645_v49  ;;  %v1681_v62 = vcombine.high %v4391_v28, %v4397_v25  ;;  %v1935_v49 = vshrl.u32 %v4261_v18, 16 }
  0xe9   : > { %v3386_v35 = vcombine.low %v1335_v40, %v1335_v40  ;;  %v4450_v37 = vrot.slane %v1714_v43, %v4056_v48  ;;  %v3512_v20 = vcombine.high %v1335_v40, %v1335_v40  ;;  %v1936_v40 = vshrl.u32 %v4285_v30, 16 }
  0xea   : > { %v1369_v43 = vrot.slane %v5204_v31, %v4056_v48  ;;  %v3523_v31 = vcombine.high %v1756_v12, %v1756_v12  ;;  %v1941_v28 = vshrl.u32 %v4305_v14, 16  ;;  %v1942_v25 = vshrl.u32 %v4315_v0, 16 }
  0xeb   : > { %1488 = vrot.lane.b32.xlu1 %v3515_v57, %s3597_s25  ;;  %1453 = vrot.lane.b32.xlu0 %v3511_v52, %s3597_s25  ;;  %5201 = vst [vmem:[#allocation3_spill] sm:$0xff] %v4450_v37  ;;  %v4455_v56 = vpop.permute.xlu1 %2923  ;;  %v4457_v57 = vpop.permute.xlu0 %2921  ;;  %v5203_v52 = vcombine.high %v4021_v41, %v4025_v42  ;;  %v3522_v26 = vcombine.high %v4450_v37, %v4450_v37 }
  0xec   : > { %v1715_v42 = vcombine.high %v1705_v7, %v1713_v46  ;;  %v1749_v7 = vcombine.high %v4388_v4, %v4394_v2  ;;  %v1947_v46 = vshrl.u32 %v4259_v1, 16  ;;  %v1953_v4 = vshrl.u32 %v4303_v21, 16 }
  0xed   : > { %v1437_v59 = vrot.slane %v5203_v52, %v4056_v48  ;;  %v1954_v2 = vshrl.u32 %v4313_v36, 16  ;;  %v1943_v51 = vpack.i.b16 %v1942_v25, %v1941_v28  ;;  %v1695_v13 = vrot.slane %v1681_v62, %v4056_v48 }
  0xef   : > { %1804 = vrot.lane.b32.xlu1 %v3406_v16, %s3595_s23  ;;  %1769 = vrot.lane.b32.xlu0 %v3399_v53, %s3595_s23  ;;  %v3518_v16 = vcombine.high %v4453_v61, %v4453_v61  ;;  %v3394_v53 = vcombine.low %v1437_v59, %v1437_v59  ;;  %v4477_v41 = vpop.permute.xlu0 %2925  ;;  %v1729_v61 = vrot.slane %v1715_v42, %v4056_v48 }
  0xf0   : > { %5205 = vst [vmem:[#allocation12_spill] sm:$0xff] %v4477_v41  ;;  %v1955_v37 = vpack.i.b16 %v1954_v2, %v1953_v4  ;;  %v1946_v41 = vpack.i.b16 %v4283_v55, %v4259_v1  ;;  %v1940_v1 = vpack.i.b16 %v4315_v0, %v4305_v14 }
  0xf3   : > { %1493 = vrot.lane.b32.xlu1 %v3393_v50, %s3598_s26  ;;  %1458 = vrot.lane.b32.xlu0 %v3386_v35, %s3598_s26  ;;  %v3387_v50 = vcombine.low %v1369_v43, %v1369_v43  ;;  %v4475_v35 = vpop.permute.xlu1 %2927  ;;  %v4483_v52 = vpop.permute.xlu0 %385 }
  0xf7   : > { %1809 = vrot.lane.b32.xlu1 %v3522_v26, %s3596_s24  ;;  %1774 = vrot.lane.b32.xlu0 %v3518_v16, %s3596_s24  ;;  %v4481_v22 = vpop.permute.xlu1 %420  ;;  %v3519_v26 = vcombine.high %v1688_v34, %v1688_v34  ;;  %v3516_v16 = vcombine.high %v1403_v19, %v1403_v19  ;;  %v4497_v34 = vpop.permute.xlu0 %390  ;;  %v1948_v19 = vshrl.u32 %v4283_v55, 16 }
  0xfb   : > { %1498 = vrot.lane.b32.xlu1 %v3394_v53, %s3600_s28  ;;  %1463 = vrot.lane.b32.xlu0 %v3387_v50, %s3600_s28  ;;  %v1661_v53 = vrot.slane %v1647_v5, %v4056_v48  ;;  %v4495_v12 = vpop.permute.xlu1 %425  ;;  %v3409_v50 = vcombine.low %v1729_v61, %v1729_v61  ;;  %v3517_v5 = vcombine.high %v1437_v59, %v1437_v59  ;;  %v4512_v54 = vpop.permute.xlu0 %395 }
  0xfd   : > { %v3402_v42 = vcombine.low %v1661_v53, %v1661_v53 }
  0xff   : > { %1814 = vrot.lane.b32.xlu1 %v3523_v31, %s3597_s25  ;;  %1779 = vrot.lane.b32.xlu0 %v3519_v26, %s3597_s25  ;;  %v1949_v31 = vpack.i.b16 %v1948_v19, %v1947_v46  ;;  %v1937_v26 = vpack.i.b16 %v1936_v40, %v1935_v49  ;;  %v4510_v6 = vpop.permute.xlu1 %430  ;;  %v4530_v46 = vrot.slane %v1955_v37, %v3895_v33 }
 0x100   : > { %v3403_v49 = vcombine.low %v1695_v13, %v1695_v13  ;;  %v4540_v19 = vrot.slane %v1946_v41, %v3895_v33  ;;  %v3520_v37 = vcombine.high %v1661_v53, %v1661_v53  ;;  %v3521_v53 = vcombine.high %v1695_v13, %v1695_v13 }
 0x101   : > { %v4522_v59 = vrot.slane %v1949_v31, %v3895_v33 }
 0x103   : > { %1503 = vrot.lane.b32.xlu1 %v3516_v16, %s3599_s27  ;;  %1468 = vrot.lane.b32.xlu0 %v3512_v20, %s3599_s27  ;;  %v3513_v20 = vcombine.high %v1369_v43, %v1369_v43  ;;  %v1763_v16 = vrot.slane %v1749_v7, %v4056_v48  ;;  %v4525_v43 = vrot.slane %v1937_v26, %v3895_v33 }
 0x104   : > { %v1952_v7 = vpack.i.b16 %v4313_v36, %v4303_v21  ;;  %v3524_v36 = vcombine.high %v1729_v61, %v1729_v61  ;;  %v2074_v0 = vcombine.low %v4522_v59, %v4530_v46 }
 0x105   : > { %v3410_v62 = vcombine.low %v1763_v16, %v1763_v16  ;;  %v3525_v61 = vcombine.high %v1763_v16, %v1763_v16 }
 0x106   : > { %v4546_v14 = vrot.slane %v1952_v7, %v3895_v33 }
 0x107   : > { %1819 = vrot.lane.b32.xlu1 %v3409_v50, %s3598_s26  ;;  %1784 = vrot.lane.b32.xlu0 %v3402_v42, %s3598_s26  ;;  %v1934_v50 = vpack.i.b16 %v4285_v30, %v4261_v18  ;;  %v4535_v18 = vrot.slane %v1943_v51, %v3895_v33  ;;  %v4551_v51 = vrot.slane %v1940_v1, %v3895_v33 }
 0x108   : > { %v2040_v28 = vcombine.low %v4540_v19, %v4546_v14 }
 0x109   : > { %v4543_v21 = vrot.slane %v1934_v50, %v3895_v33  ;;  %v2006_v40 = vcombine.low %v4525_v43, %v4535_v18 }
 0x10a   : > { %v4566_v50 = vrot.slane %v2040_v28, %v4056_v48 }
 0x10b   : > { %1508 = vrot.lane.b32.xlu1 %v3517_v5, %s3601_s29  ;;  %1473 = vrot.lane.b32.xlu0 %v3513_v20, %s3601_s29  ;;  %v1972_v2 = vcombine.low %v4543_v21, %v4551_v51  ;;  %v2082_v5 = vrot.slane %v2074_v0, %v4056_v48  ;;  %v2014_v20 = vrot.slane %v2006_v40, %v4056_v48 }
 0x10d   : > { %v717_v55 = vpop.permute.xlu1 %716  ;;  %v682_v30 = vpop.permute.xlu0 %681  ;;  %v3422_v13 = vcombine.low %v2082_v5, %v2082_v5  ;;  %v3415_v16 = vcombine.low %v2014_v20, %v2014_v20  ;;  %v4569_v7 = vrot.slane %v1972_v2, %v4056_v48 }
 0x10f   : > { %1824 = vrot.lane.b32.xlu1 %v3410_v62, %s3600_s28  ;;  %1789 = vrot.lane.b32.xlu0 %v3403_v49, %s3600_s28  ;;  %v5206_v62 = vld [vmem:[#allocation6_spill] sm:$0xff]  ;;  %v5207_v49 = vld [vmem:[#allocation7_spill] sm:$0xff]  ;;  %v3526_v28 = vcombine.high %v4569_v7, %v4569_v7 }
 0x111   : > { %v727_v4 = vpop.permute.xlu1 %726  ;;  %v692_v41 = vpop.permute.xlu0 %691 }
 0x113   : > { %1829 = vrot.lane.b32.xlu1 %v3524_v36, %s3599_s27  ;;  %1794 = vrot.lane.b32.xlu0 %v3520_v37, %s3599_s27 }
 0x115   : > { %v737_v25 = vpop.permute.xlu1 %736  ;;  %v702_v42 = vpop.permute.xlu0 %701 }
 0x117   : > { %1834 = vrot.lane.b32.xlu1 %v3525_v61, %s3601_s29  ;;  %1799 = vrot.lane.b32.xlu0 %v3521_v53, %s3601_s29  ;;  %v3530_v53 = vcombine.high %v4566_v50, %v4566_v50 }
 0x119   : > { %v712_v31 = vpop.permute.xlu1 %711  ;;  %v677_v26 = vpop.permute.xlu0 %676 }
 0x11a   : > { %v760_v1 = vsel %vm452_vm6, %v5206_v62, %v712_v31  ;;  %v745_v36 = vsel %vm452_vm6, %v5207_v49, %v677_v26  ;;  %v2041_v26 = vcombine.high %v4540_v19, %v4546_v14 }
 0x11b   : > { %2130 = vrot.lane.b32.xlu1 %v3422_v13, %s3595_s23  ;;  %2095 = vrot.lane.b32.xlu0 %v3415_v16, %s3595_s23  ;;  %v762_v37 = vsel %vm456_vm7, %v760_v1, %v717_v55  ;;  %v747_v40 = vsel %vm456_vm7, %v745_v36, %v682_v30  ;;  %v5208_v55 = vcombine.low %v4179_v39, %v4187_v45 }
 0x11c   : > { %v5209_v13 = vcombine.low %v4183_v29, %v4191_v24 }
 0x11d   : > { %v722_v0 = vpop.permute.xlu1 %721  ;;  %v687_v61 = vpop.permute.xlu0 %686  ;;  %v4591_v30 = vrot.slane %v5208_v55, %v4056_v48 }
 0x11e   : > { %v764_v2 = vsel %vm459_vm8, %v762_v37, %v722_v0  ;;  %v749_v31 = vsel %vm459_vm8, %v747_v40, %v687_v61  ;;  %v4599_v16 = vrot.slane %v5209_v13, %v4056_v48  ;;  %v3531_v37 = vcombine.high %v2082_v5, %v2082_v5  ;;  %v200_v13 = vld [vmem:[%s5150_s1 + $0x4] sm:$0xf] }
 0x11f   : > { %2135 = vrot.lane.b32.xlu1 %v3530_v53, %s3596_s24  ;;  %2100 = vrot.lane.b32.xlu0 %v3526_v28, %s3596_s24  ;;  %v766_v62 = vsel %vm462_vm9, %v764_v2, %v727_v4  ;;  %v751_v49 = vsel %vm462_vm9, %v749_v31, %v692_v41  ;;  %v3527_v0 = vcombine.high %v2014_v20, %v2014_v20 }
 0x120   : > { %v1973_v40 = vcombine.high %v4543_v21, %v4551_v51  ;;  %v3442_v14 = vcombine.low %v4591_v30, %v4591_v30  ;;  %v3435_v4 = vcombine.low %v4599_v16, %v4599_v16  ;;  %v2055_v20 = vrot.slane %v2041_v26, %v4056_v48 }
 0x121   : > { %v732_v1 = vpop.permute.xlu1 %731  ;;  %v697_v36 = vpop.permute.xlu0 %696 }
 0x122   : > { %v768_v61 = vsel %vm465_vm10, %v766_v62, %v732_v1  ;;  %v753_v19 = vsel %vm465_vm10, %v751_v49, %v697_v36  ;;  %v1987_v2 = vrot.slane %v1973_v40, %v4056_v48  ;;  %v2075_v62 = vcombine.high %v4522_v59, %v4530_v46 }
 0x123   : > { %2140 = vrot.lane.b32.xlu1 %v3531_v37, %s3597_s25  ;;  %2105 = vrot.lane.b32.xlu0 %v3527_v0, %s3597_s25  ;;  %v770_v21 = vsel %vm468_vm11, %v768_v61, %v737_v25  ;;  %v755_v51 = vsel %vm468_vm11, %v753_v19, %v702_v42  ;;  %v5210_v25 = vcombine.low %v4209_v32, %v4215_v23  ;;  %v5212_v46 = vmov 0  }
 0x124   : > { %v5211_v42 = vcombine.low %v4291_v9, %v4297_v15  ;;  %v3425_v36 = vcombine.low %v2055_v20, %v2055_v20  ;;  %v2007_v37 = vcombine.high %v4525_v43, %v4535_v18  ;;  %v3418_v0 = vcombine.low %v1987_v2, %v1987_v2 }
 0x125   : > { %v742_v41 = vpop.permute.xlu1 %741  ;;  %v707_v5 = vpop.permute.xlu0 %706  ;;  %v4626_v55 = vrot.slane %v5210_v25, %v4056_v48  ;;  %v4659_v43 = vrot.slane %v2075_v62, %v4056_v48 }
 0x126   : > { %v772_v53 = vsel %vm471_vm12, %v770_v21, %v742_v41  ;;  %v757_v28 = vsel %vm471_vm12, %v755_v51, %v707_v5  ;;  %v4633_v26 = vrot.slane %v5211_v42, %v4056_v48  ;;  %v4662_v18 = vrot.slane %v2007_v37, %v4056_v48 }
 0x127   : > { %2475 = vrot.lane.b32.xlu1 %v3442_v14, %s3595_s23  ;;  %3363 = vmatprep.subr.msk.bf16.mxu0 %vm777_vm13, %v772_v53  ;;  %v778_v31 = vsel %vm777_vm13, %v757_v28, 0  ;;  %v3538_v40 = vcombine.high %v4626_v55, %v4626_v55  ;;  %v3426_v41 = vcombine.low %v4659_v43, %v4659_v43  ;;  %v3539_v21 = vcombine.high %v4591_v30, %v4591_v30 }
 0x128   : > { %2440 = vrot.lane.b32.xlu0 %v3435_v4, %s3595_s23  ;;  %797 = vmatpush1.bf16.msra.mxu0 %v778_v31  ;;  %v3534_v59 = vcombine.high %v4633_v26, %v4633_v26  ;;  %v3419_v5 = vcombine.low %v4662_v18, %v4662_v18  ;;  %v3535_v51 = vcombine.high %v4599_v16, %v4599_v16  ;;  %v2618_v42 = vshrl.u32 %v4327_v47, 16 }
 0x129   : > { %v4640_v1 = vpop.permute.xlu1 %1085  ;;  %v4642_v49 = vpop.permute.xlu0 %1050  ;;  %v5213_v31 = vcombine.high %v4209_v32, %v4215_v23  ;;  %v5214_v30 = vcombine.high %v4291_v9, %v4297_v15  ;;  %v3532_v37 = vcombine.high %v2055_v20, %v2055_v20  ;;  %v2606_v32 = vshrl.u32 %v4329_v3, 16 }
 0x12a   : > { %v2607_v23 = vshrl.u32 %v4340_v10, 16 }
 0x12b   : > { %2145 = vrot.lane.b32.xlu1 %v3425_v36, %s3598_s26  ;;  %3364 = vmatmul.mubr.msk.bf16.vlgmr.msra.gmra.mxu0 %vm773_vm14, %v200_v13  ;;  %v4685_v25 = vrot.slane %v5213_v31, %v4056_v48  ;;  %v2619_v13 = vshrl.u32 %v4338_v63, 16  ;;  %v4694_v16 = vrot.slane %v5214_v30, %v4056_v48  ;;  %v5217_v30 = vcombine.high %v4179_v39, %v4187_v45 }
 0x12c   : > { %2110 = vrot.lane.b32.xlu0 %v3418_v0, %s3598_s26  ;;  %1186 = vmatprep.mubr.bf16.mxu0 %v5212_v46  ;;  %v3528_v0 = vcombine.high %v1987_v2, %v1987_v2 }
 0x12d   : > { %v4654_v61 = vpop.permute.xlu1 %435  ;;  %v4656_v19 = vpop.permute.xlu0 %400  ;;  %v3445_v9 = vcombine.low %v4685_v25, %v4685_v25  ;;  %v2620_v15 = vpack.i.b16 %v2619_v13, %v2618_v42  ;;  %v2623_v42 = vpack.i.b16 %v4399_v60, %v4365_v58 }
 0x12f   : > { %2480 = vrot.lane.b32.xlu1 %v3538_v40, %s3596_s24  ;;  %v2617_v40 = vpack.i.b16 %v4338_v63, %v4327_v47  ;;  %v3438_v47 = vcombine.low %v4694_v16, %v4694_v16  ;;  %v2612_v63 = vshrl.u32 %v4367_v11, 16  ;;  %v4751_v39 = vrot.slane %v2620_v15, %v3895_v33 }
 0x130   : > { %2445 = vrot.lane.b32.xlu0 %v3534_v59, %s3596_s24  ;;  %v2605_v59 = vpack.i.b16 %v4340_v10, %v4329_v3  ;;  %v2624_v3 = vshrl.u32 %v4365_v58, 16  ;;  %v2625_v10 = vshrl.u32 %v4399_v60, 16  ;;  %v2611_v58 = vpack.i.b16 %v4401_v38, %v4367_v11 }
 0x131   : > { %v4666_v14 = vpop.permute.xlu1 %1090  ;;  %v4668_v4 = vpop.permute.xlu0 %1055  ;;  %v5218_v60 = vcombine.high %v4183_v29, %v4191_v24  ;;  %v3533_v11 = vcombine.high %v4659_v43, %v4659_v43 }
 0x132   : > { %v2626_v45 = vpack.i.b16 %v2625_v10, %v2624_v3 }
 0x133   : > { %2150 = vrot.lane.b32.xlu1 %v3426_v41, %s3600_s28  ;;  %v5215_v41 = vld [vmem:[#allocation4_spill] sm:$0xff] }
 0x134   : > { %2115 = vrot.lane.b32.xlu0 %v3419_v5, %s3600_s28  ;;  %v476_v20 = vsel %vm452_vm6, %v5215_v41, %v4481_v22  ;;  %v5216_v5 = vld [vmem:[#allocation5_spill] sm:$0xff]  ;;  %v2608_v22 = vpack.i.b16 %v2607_v23, %v2606_v32  ;;  %v4739_v32 = vrot.slane %v2605_v59, %v3895_v33  ;;  %v3529_v59 = vcombine.high %v4662_v18, %v4662_v18 }
 0x135   : > { %v441_v53 = vpop.permute.xlu1 %440  ;;  %v406_v28 = vpop.permute.xlu0 %405  ;;  %v455_v2 = vsel %vm452_vm6, %v5216_v5, %v4483_v52  ;;  %v478_v52 = vsel %vm456_vm7, %v476_v20, %v4495_v12  ;;  %v4748_v12 = vrot.slane %v5218_v60, %v4056_v48  ;;  %v4779_v41 = vrot.slane %v2611_v58, %v3895_v33 }
 0x136   : > { %v458_v13 = vsel %vm456_vm7, %v455_v2, %v4497_v34  ;;  %v480_v29 = vsel %vm459_vm8, %v478_v52, %v4510_v6  ;;  %v4787_v20 = vrot.slane %v2626_v45, %v3895_v33  ;;  %v199_v52 = vld [vmem:[%s5150_s1] sm:$0xf]  ;;  %v2950_v58 = vshrl.u32 %v4455_v56, 16 }
 0x137   : > { %2485 = vrot.lane.b32.xlu1 %v3539_v21, %s3597_s25  ;;  %v2613_v21 = vshrl.u32 %v4401_v38, 16  ;;  %v4760_v38 = vrot.slane %v2608_v22, %v3895_v33  ;;  %v461_v24 = vsel %vm459_vm8, %v458_v13, %v4512_v54  ;;  %v482_v15 = vsel %vm462_vm9, %v480_v29, %v4654_v61  ;;  %v5219_v29 = vld [vmem:[#allocation12_spill] sm:$0xff] }
 0x138   : > { %2450 = vrot.lane.b32.xlu0 %v3535_v51, %s3597_s25  ;;  %v464_v43 = vsel %vm462_vm9, %v461_v24, %v4656_v19  ;;  %v484_v54 = vsel %vm465_vm10, %v482_v15, %v441_v53  ;;  %v3439_v61 = vcombine.low %v4748_v12, %v4748_v12  ;;  %v2944_v53 = vshrl.u32 %v4421_v17, 16 }
 0x139   : > { %v4696_v62 = vpop.permute.xlu1 %1095  ;;  %v4698_v36 = vpop.permute.xlu0 %1060  ;;  %v2614_v34 = vpack.i.b16 %v2613_v21, %v2612_v63  ;;  %v467_v18 = vsel %vm465_vm10, %v464_v43, %v406_v28  ;;  %v2932_v28 = vshrl.u32 %v4423_v44, 16  ;;  %v2945_v21 = vshrl.u32 %v4443_v27, 16 }
 0x13a   : > { %v2933_v22 = vshrl.u32 %v4445_v8, 16  ;;  %v2939_v24 = vshrl.u32 %v5219_v29, 16 }
 0x13b   : > { %2155 = vrot.lane.b32.xlu1 %v3532_v37, %s3599_s27  ;;  %v4733_v37 = vrot.slane %v5217_v30, %v4056_v48  ;;  %v4790_v19 = vrot.slane %v2614_v34, %v3895_v33  ;;  %v2745_v30 = vcombine.low %v4751_v39, %v4787_v20  ;;  %v2643_v34 = vcombine.low %v4739_v32, %v4779_v41 }
 0x13c   : > { %2120 = vrot.lane.b32.xlu0 %v3528_v0, %s3599_s27  ;;  %v4736_v0 = vrot.slane %v2617_v40, %v3895_v33  ;;  %v2934_v15 = vpack.i.b16 %v2933_v22, %v2932_v28 }
 0x13d   : > { %v446_v51 = vpop.permute.xlu1 %445  ;;  %v411_v31 = vpop.permute.xlu0 %410  ;;  %v3446_v6 = vcombine.low %v4733_v37, %v4733_v37  ;;  %v3541_v43 = vcombine.high %v4733_v37, %v4733_v37 }
 0x13e   : > { %v486_v5 = vsel %vm468_vm11, %v484_v54, %v446_v51  ;;  %v470_v2 = vsel %vm468_vm11, %v467_v18, %v411_v31  ;;  %v3540_v31 = vcombine.high %v4685_v25, %v4685_v25  ;;  %v2951_v25 = vshrl.u32 %v4475_v35, 16  ;;  %v5221_v18 = vld [vmem:[#allocation9_spill] sm:$0xff] }
 0x13f   : > { %2490 = vrot.lane.b32.xlu1 %v3445_v9, %s3598_s26  ;;  %v4769_v9 = vrot.slane %v2623_v42, %v3895_v33  ;;  %v3536_v42 = vcombine.high %v4694_v16, %v4694_v16  ;;  %v2677_v16 = vcombine.low %v4760_v38, %v4790_v19 }
 0x140   : > { %2455 = vrot.lane.b32.xlu0 %v3438_v47, %s3598_s26 }
 0x141   : > { %v4753_v23 = vpop.permute.xlu1 %1100  ;;  %v4755_v40 = vpop.permute.xlu0 %1065  ;;  %v2711_v13 = vcombine.low %v4736_v0, %v4769_v9 }
 0x143   : > { %2160 = vrot.lane.b32.xlu1 %v3533_v11, %s3601_s29  ;;  %v2938_v11 = vshrl.u32 %v4457_v57, 16  ;;  %v4862_v22 = vrot.slane %v2711_v13, %v4056_v48 }
 0x144   : > { %2125 = vrot.lane.b32.xlu0 %v3529_v59, %s3601_s29  ;;  %v2946_v59 = vpack.i.b16 %v2945_v21, %v2944_v53  ;;  %v2753_v53 = vrot.slane %v2745_v30, %v4056_v48 }
 0x145   : > { %v451_v47 = vpop.permute.xlu1 %450  ;;  %v416_v3 = vpop.permute.xlu0 %415  ;;  %v2940_v28 = vpack.i.b16 %v2939_v24, %v2938_v11  ;;  %v2949_v11 = vpack.i.b16 %v4475_v35, %v4455_v56  ;;  %v2712_v56 = vcombine.high %v4736_v0, %v4769_v9  ;;  %v2644_v35 = vcombine.high %v4739_v32, %v4779_v41 }
 0x146   : > { %v488_v63 = vsel %vm471_vm12, %v486_v5, %v451_v47  ;;  %v473_v10 = vsel %vm471_vm12, %v470_v2, %v416_v3  ;;  %v3537_v5 = vcombine.high %v4748_v12, %v4748_v12  ;;  %v2952_v2 = vpack.i.b16 %v2951_v25, %v2950_v58 }
 0x147   : > { %2495 = vrot.lane.b32.xlu1 %v3446_v6, %s3600_s28  ;;  %3365 = vmatprep.subr.msk.bf16.mxu1 %vm777_vm13, %v488_v63  ;;  %v826_v51 = vsel %vm777_vm13, %v473_v10, 0  ;;  %v5220_v6 = vld [vmem:[#allocation8_spill] sm:$0xff]  ;;  %v2685_v63 = vrot.slane %v2677_v16, %v4056_v48  ;;  %v4848_v10 = vrot.slane %v2946_v59, %v3895_v33  ;;  %v3458_v30 = vcombine.low %v2753_v53, %v2753_v53 }
 0x148   : > { %2460 = vrot.lane.b32.xlu0 %v3439_v61, %s3600_s28  ;;  %845 = vmatpush1.bf16.msra.mxu1 %v826_v51  ;;  %v1134_v54 = vsel %vm452_vm6, %v5220_v6, %v4640_v1  ;;  %v1119_v61 = vsel %vm452_vm6, %v5221_v18, %v4642_v49  ;;  %v4865_v51 = vrot.slane %v2643_v34, %v4056_v48  ;;  %v201_v34 = vld [vmem:[%s5150_s1 + $0x8] sm:$0xf] }
 0x149   : > { %v1106_v60 = vpop.permute.xlu1 %1105  ;;  %v1071_v45 = vpop.permute.xlu0 %1070  ;;  %v1136_v37 = vsel %vm456_vm7, %v1134_v54, %v4666_v14  ;;  %v1121_v47 = vsel %vm456_vm7, %v1119_v61, %v4668_v4  ;;  %v4851_v14 = vrot.slane %v2934_v15, %v3895_v33  ;;  %v4873_v58 = vrot.slane %v2940_v28, %v3895_v33 }
 0x14a   : > { %v1138_v49 = vsel %vm459_vm8, %v1136_v37, %v4696_v62  ;;  %v1123_v12 = vsel %vm459_vm8, %v1121_v47, %v4698_v36  ;;  %v2943_v16 = vpack.i.b16 %v4443_v27, %v4421_v17  ;;  %v2931_v6 = vpack.i.b16 %v4445_v8, %v4423_v44 }
 0x14b   : > { %2500 = vrot.lane.b32.xlu1 %v3540_v31, %s3599_s27  ;;  %3366 = vmatmul.mubr.msk.bf16.vlgmr.msra.gmra.mxu1 %vm773_vm14, %v199_v52  ;;  %v1140_v4 = vsel %vm462_vm9, %v1138_v49, %v4753_v23  ;;  %v1125_v21 = vsel %vm462_vm9, %v1123_v12, %v4755_v40  ;;  %v4868_v31 = vrot.slane %v2952_v2, %v3895_v33 }
 0x14c   : > { %2465 = vrot.lane.b32.xlu0 %v3536_v42, %s3599_s27  ;;  %1579 = vmatprep.mubr.bf16.mxu1 %v5212_v46  ;;  %v1142_v62 = vsel %vm465_vm10, %v1140_v4, %v1106_v60  ;;  %v1127_v36 = vsel %vm465_vm10, %v1125_v21, %v1071_v45  ;;  %v3451_v60 = vcombine.low %v2685_v63, %v2685_v63 }
 0x14d   : > { %v1111_v3 = vpop.permute.xlu1 %1110  ;;  %v1076_v1 = vpop.permute.xlu0 %1075  ;;  %v3071_v24 = vcombine.low %v4848_v10, %v4868_v31  ;;  %v2937_v54 = vpack.i.b16 %v5219_v29, %v4457_v57  ;;  %v3003_v17 = vcombine.low %v4851_v14, %v4873_v58  ;;  %v3542_v27 = vcombine.high %v4865_v51, %v4865_v51 }
 0x14e   : > { %v1144_v23 = vsel %vm468_vm11, %v1142_v62, %v1111_v3  ;;  %v1129_v40 = vsel %vm468_vm11, %v1127_v36, %v1076_v1  ;;  %v3028_v44 = vrot.slane %v2943_v16, %v3895_v33  ;;  %v3036_v8 = vrot.slane %v2949_v11, %v3895_v33 }
 0x14f   : > { %2505 = vrot.lane.b32.xlu1 %v3541_v43, %s3601_s29  ;;  %v3546_v43 = vcombine.high %v4862_v22, %v4862_v22  ;;  %v3547_v18 = vcombine.high %v2753_v53, %v2753_v53  ;;  %v3079_v61 = vrot.slane %v3071_v24, %v4056_v48  ;;  %v2960_v0 = vrot.slane %v2931_v6, %v3895_v33 }
 0x150   : > { %2470 = vrot.lane.b32.xlu0 %v3537_v5, %s3601_s29  ;;  %v2968_v9 = vrot.slane %v2937_v54, %v3895_v33  ;;  %v3543_v32 = vcombine.high %v2685_v63, %v2685_v63  ;;  %v3011_v41 = vrot.slane %v3003_v17, %v4056_v48  ;;  %v3037_v5 = vcombine.low %v3028_v44, %v3036_v8 }
 0x151   : > { %v1116_v42 = vpop.permute.xlu1 %1115  ;;  %v1081_v52 = vpop.permute.xlu0 %1080  ;;  %v3474_v47 = vcombine.low %v3079_v61, %v3079_v61  ;;  %v2726_v3 = vrot.slane %v2712_v56, %v4056_v48  ;;  %v2658_v28 = vrot.slane %v2644_v35, %v4056_v48  ;;  %v2746_v33 = vcombine.high %v4751_v39, %v4787_v20 }
 0x152   : > { %v1146_v25 = vsel %vm471_vm12, %v1144_v23, %v1116_v42  ;;  %v1131_v13 = vsel %vm471_vm12, %v1129_v40, %v1081_v52  ;;  %v2969_v1 = vcombine.low %v2960_v0, %v2968_v9  ;;  %v3467_v53 = vcombine.low %v3011_v41, %v3011_v41 }
 0x153   : > { %v1150_v45 = vsel %vm777_vm13, %v1131_v13, 0  ;;  %2801 = vrot.lane.b32.xlu1 %v3458_v30, %s3595_s23  ;;  %3381 = vmatprep.subr.msk.bf16.mxu0 %vm777_vm13, %v1146_v25  ;;  %v3461_v63 = vcombine.low %v2726_v3, %v2726_v3  ;;  %v4939_v4 = vrot.slane %v3037_v5, %v4056_v48  ;;  %v2678_v21 = vcombine.high %v4760_v38, %v4790_v19 }
 0x154   : > { %2766 = vrot.lane.b32.xlu0 %v3451_v60, %s3595_s23  ;;  %1169 = vmatpush1.bf16.msra.mxu0 %v1150_v45  ;;  %v3454_v62 = vcombine.low %v2658_v28, %v2658_v28  ;;  %v4944_v36 = vrot.slane %v2969_v1, %v4056_v48  ;;  %v2760_v40 = vrot.slane %v2746_v33, %v4056_v48 }
 0x155   : > { %v4890_v59 = vpop.permute.xlu1 %1478  ;;  %v4892_v15 = vpop.permute.xlu0 %1443  ;;  %v3554_v23 = vcombine.high %v4939_v4, %v4939_v4  ;;  %v2692_v38 = vrot.slane %v2678_v21, %v4056_v48  ;;  %v3038_v13 = vcombine.high %v3028_v44, %v3036_v8  ;;  %v2970_v16 = vcombine.high %v2960_v0, %v2968_v9  ;;  %v5222_v0 = vld [vmem:[#allocation10_spill] sm:$0xff] }
 0x156   : > { %v3550_v42 = vcombine.high %v4944_v36, %v4944_v36  ;;  %v3462_v30 = vcombine.low %v2760_v40, %v2760_v40  ;;  %v3551_v11 = vcombine.high %v3011_v41, %v3011_v41  ;;  %v3548_v6 = vcombine.high %v2726_v3, %v2726_v3 }
 0x157   : > { %2806 = vrot.lane.b32.xlu1 %v3546_v43, %s3596_s24  ;;  %3382 = vmatmul.mubr.msk.bf16.vlgmr.msra.gmra.mxu0 %vm773_vm14, %v201_v34  ;;  %v3455_v25 = vcombine.low %v2692_v38, %v2692_v38  ;;  %v3555_v34 = vcombine.high %v3079_v61, %v3079_v61  ;;  %v3052_v54 = vrot.slane %v3038_v13, %v4056_v48 }
 0x158   : > { %2771 = vrot.lane.b32.xlu0 %v3542_v27, %s3596_s24  ;;  %1905 = vmatprep.mubr.bf16.mxu0 %v5212_v46  ;;  %v3544_v17 = vcombine.high %v2658_v28, %v2658_v28  ;;  %v2984_v27 = vrot.slane %v2970_v16, %v4056_v48  ;;  %v3072_v56 = vcombine.high %v4848_v10, %v4868_v31 }
 0x159   : > { %v4914_v57 = vpop.permute.xlu1 %1483  ;;  %v4916_v29 = vpop.permute.xlu0 %1448  ;;  %v3477_v8 = vcombine.low %v3052_v54, %v3052_v54  ;;  %v1527_v9 = vsel %vm452_vm6, %v5222_v0, %v4890_v59  ;;  %v3549_v5 = vcombine.high %v2760_v40, %v2760_v40  ;;  %v203_v0 = vld [vmem:[%s5150_s1 + $0x10] sm:$0xf] }
 0x15a   : > { %v3470_v61 = vcombine.low %v2984_v27, %v2984_v27  ;;  %v1529_v10 = vsel %vm456_vm7, %v1527_v9, %v4914_v57 }
 0x15b   : > { %2811 = vrot.lane.b32.xlu1 %v3547_v18, %s3597_s25  ;;  %v3004_v18 = vcombine.high %v4851_v14, %v4873_v58 }
 0x15c   : > { %2776 = vrot.lane.b32.xlu0 %v3543_v32, %s3597_s25  ;;  %v5223_v32 = vld [vmem:[#allocation2_spill] sm:$0xff] }
 0x15d   : > { %v4924_v2 = vpop.permute.xlu1 %1488  ;;  %v4926_v37 = vpop.permute.xlu0 %1453  ;;  %v1512_v41 = vsel %vm452_vm6, %v5223_v32, %v4892_v15  ;;  %v3545_v15 = vcombine.high %v2692_v38, %v2692_v38  ;;  %v3018_v1 = vrot.slane %v3004_v18, %v4056_v48  ;;  %v3556_v38 = vcombine.high %v3052_v54, %v3052_v54 }
 0x15e   : > { %v1514_v31 = vsel %vm456_vm7, %v1512_v41, %v4916_v29  ;;  %v1531_v59 = vsel %vm459_vm8, %v1529_v10, %v4924_v2 }
 0x15f   : > { %3127 = vrot.lane.b32.xlu1 %v3474_v47, %s3595_s23  ;;  %v3086_v47 = vrot.slane %v3072_v56, %v4056_v48  ;;  %v1516_v3 = vsel %vm459_vm8, %v1514_v31, %v4926_v37 }
 0x160   : > { %3092 = vrot.lane.b32.xlu0 %v3467_v53, %s3595_s23 }
 0x161   : > { %v4934_v49 = vpop.permute.xlu1 %1804  ;;  %v4936_v12 = vpop.permute.xlu0 %1769  ;;  %v3478_v21 = vcombine.low %v3086_v47, %v3086_v47  ;;  %v3557_v54 = vcombine.high %v3086_v47, %v3086_v47 }
 0x163   : > { %2816 = vrot.lane.b32.xlu1 %v3461_v63, %s3598_s26 }
 0x164   : > { %2781 = vrot.lane.b32.xlu0 %v3454_v62, %s3598_s26 }
 0x165   : > { %v1494_v39 = vpop.permute.xlu1 %1493  ;;  %v1459_v20 = vpop.permute.xlu0 %1458 }
 0x166   : > { %v1533_v53 = vsel %vm462_vm9, %v1531_v59, %v1494_v39  ;;  %v1518_v57 = vsel %vm462_vm9, %v1516_v3, %v1459_v20  ;;  %v3471_v39 = vcombine.low %v3018_v1, %v3018_v1 }
 0x167   : > { %3132 = vrot.lane.b32.xlu1 %v3554_v23, %s3596_s24  ;;  %v202_v23 = vld [vmem:[%s5150_s1 + $0xc] sm:$0xf] }
 0x168   : > { %3097 = vrot.lane.b32.xlu0 %v3550_v42, %s3596_s24 }
 0x169   : > { %v4956_v19 = vpop.permute.xlu1 %1809  ;;  %v4958_v52 = vpop.permute.xlu0 %1774 }
 0x16b   : > { %2821 = vrot.lane.b32.xlu1 %v3462_v30, %s3600_s28  ;;  %v3552_v30 = vcombine.high %v2984_v27, %v2984_v27 }
 0x16c   : > { %2786 = vrot.lane.b32.xlu0 %v3455_v25, %s3600_s28  ;;  %v5224_v25 = vld [vmem:[#allocation3_spill] sm:$0xff] }
 0x16d   : > { %v1499_v60 = vpop.permute.xlu1 %1498  ;;  %v1464_v45 = vpop.permute.xlu0 %1463  ;;  %v1853_v13 = vsel %vm452_vm6, %v5224_v25, %v4934_v49 }
 0x16e   : > { %v1535_v29 = vsel %vm465_vm10, %v1533_v53, %v1499_v60  ;;  %v1520_v28 = vsel %vm465_vm10, %v1518_v57, %v1464_v45  ;;  %v5225_v60 = vld [vmem:[#allocation11_spill] sm:$0xff] }
 0x16f   : > { %3137 = vrot.lane.b32.xlu1 %v3555_v34, %s3597_s25  ;;  %v1838_v45 = vsel %vm452_vm6, %v5225_v60, %v4936_v12  ;;  %v1855_v34 = vsel %vm456_vm7, %v1853_v13, %v4956_v19  ;;  %v3553_v12 = vcombine.high %v3018_v1, %v3018_v1 }
 0x170   : > { %3102 = vrot.lane.b32.xlu0 %v3551_v11, %s3597_s25  ;;  %v1840_v16 = vsel %vm456_vm7, %v1838_v45, %v4958_v52 }
 0x171   : > { %v4964_v24 = vpop.permute.xlu1 %1814  ;;  %v4966_v43 = vpop.permute.xlu0 %1779 }
 0x172   : > { %v1857_v49 = vsel %vm459_vm8, %v1855_v34, %v4964_v24 }
 0x173   : > { %2826 = vrot.lane.b32.xlu1 %v3548_v6, %s3599_s27 }
 0x174   : > { %2791 = vrot.lane.b32.xlu0 %v3544_v17, %s3599_s27  ;;  %v1842_v17 = vsel %vm459_vm8, %v1840_v16, %v4966_v43  ;;  %v204_v16 = vld [vmem:[%s5150_s1 + $0x14] sm:$0xf] }
 0x175   : > { %v1504_v35 = vpop.permute.xlu1 %1503  ;;  %v1469_v44 = vpop.permute.xlu0 %1468 }
 0x176   : > { %v1537_v2 = vsel %vm468_vm11, %v1535_v29, %v1504_v35  ;;  %v1522_v33 = vsel %vm468_vm11, %v1520_v28, %v1469_v44 }
 0x177   : > { %3142 = vrot.lane.b32.xlu1 %v3477_v8, %s3598_s26 }
 0x178   : > { %3107 = vrot.lane.b32.xlu0 %v3470_v61, %s3598_s26 }
 0x179   : > { %v1820_v14 = vpop.permute.xlu1 %1819  ;;  %v1785_v58 = vpop.permute.xlu0 %1784 }
 0x17a   : > { %v1859_v27 = vsel %vm462_vm9, %v1857_v49, %v1820_v14  ;;  %v1844_v56 = vsel %vm462_vm9, %v1842_v17, %v1785_v58 }
 0x17b   : > { %2831 = vrot.lane.b32.xlu1 %v3549_v5, %s3601_s29 }
 0x17c   : > { %2796 = vrot.lane.b32.xlu0 %v3545_v15, %s3601_s29 }
 0x17d   : > { %v1509_v37 = vpop.permute.xlu1 %1508  ;;  %v1474_v63 = vpop.permute.xlu0 %1473 }
 0x17e   : > { %v1539_v48 = vsel %vm471_vm12, %v1537_v2, %v1509_v37  ;;  %v1524_v62 = vsel %vm471_vm12, %v1522_v33, %v1474_v63 }
 0x17f   : > { %v1543_v20 = vsel %vm777_vm13, %v1524_v62, 0  ;;  %3147 = vrot.lane.b32.xlu1 %v3478_v21, %s3600_s28  ;;  %3397 = vmatprep.subr.msk.bf16.mxu1 %vm777_vm13, %v1539_v48 }
 0x180   : > { %3112 = vrot.lane.b32.xlu0 %v3471_v39, %s3600_s28  ;;  %1562 = vmatpush1.bf16.msra.mxu1 %v1543_v20  ;;  %s3485_s28 = sshll.u32 %s5227_s16, 4 }
 0x181   : > { %v1825_v40 = vpop.permute.xlu1 %1824  ;;  %v1790_v42 = vpop.permute.xlu0 %1789  ;;  %s197_s5 = scalar_lea.vmem %s5153_s4, %s3485_s28 }
 0x182   : > { %v1861_v19 = vsel %vm465_vm10, %v1859_v27, %v1825_v40  ;;  %v1846_v52 = vsel %vm465_vm10, %v1844_v56, %v1790_v42 }
 0x183   : > { %3152 = vrot.lane.b32.xlu1 %v3556_v38, %s3599_s27  ;;  %3398 = vmatmul.mubr.msk.bf16.vlgmr.msra.gmra.mxu1 %vm773_vm14, %v202_v23 }
 0x184   : > { %3117 = vrot.lane.b32.xlu0 %v3552_v30, %s3599_s27  ;;  %2231 = vmatprep.mubr.bf16.mxu1 %v5212_v46 }
 0x185   : > { %v1830_v11 = vpop.permute.xlu1 %1829  ;;  %v1795_v6 = vpop.permute.xlu0 %1794 }
 0x186   : > { %v1863_v35 = vsel %vm468_vm11, %v1861_v19, %v1830_v11  ;;  %v1848_v24 = vsel %vm468_vm11, %v1846_v52, %v1795_v6 }
 0x187   : > { %3157 = vrot.lane.b32.xlu1 %v3557_v54, %s3601_s29 }
 0x188   : > { %3122 = vrot.lane.b32.xlu0 %v3553_v12, %s3601_s29 }
 0x189   : > { %v1835_v44 = vpop.permute.xlu1 %1834  ;;  %v1800_v8 = vpop.permute.xlu0 %1799 }
 0x18a   : > { %v1865_v43 = vsel %vm471_vm12, %v1863_v35, %v1835_v44  ;;  %v1850_v18 = vsel %vm471_vm12, %v1848_v24, %v1800_v8 }
 0x18b   : > { %v1869_v61 = vsel %vm777_vm13, %v1850_v18, 0  ;;  %3413 = vmatprep.subr.msk.bf16.mxu0 %vm777_vm13, %v1865_v43 }
 0x18c   : > { %1888 = vmatpush1.bf16.msra.mxu0 %v1869_v61 }
 0x18d   : > { %v2131_v9 = vpop.permute.xlu1 %2130  ;;  %v2096_v32 = vpop.permute.xlu0 %2095 }
 0x18e   : > { %v2179_v33 = vsel %vm452_vm6, %v4566_v50, %v2131_v9  ;;  %v2164_v37 = vsel %vm452_vm6, %v4569_v7, %v2096_v32  ;;  %v205_v32 = vld [vmem:[%s5150_s1 + $0x18] sm:$0xf] }
 0x18f   : > { %3414 = vmatmul.mubr.msk.bf16.vlgmr.msra.gmra.mxu0 %vm773_vm14, %v203_v0 }
 0x190   : > { %2576 = vmatprep.mubr.bf16.mxu0 %v5212_v46 }
 0x191   : > { %v2136_v41 = vpop.permute.xlu1 %2135  ;;  %v2101_v10 = vpop.permute.xlu0 %2100 }
 0x192   : > { %v2181_v63 = vsel %vm456_vm7, %v2179_v33, %v2136_v41  ;;  %v2166_v48 = vsel %vm456_vm7, %v2164_v37, %v2101_v10 }
 0x195   : > { %v2141_v31 = vpop.permute.xlu1 %2140  ;;  %v2106_v14 = vpop.permute.xlu0 %2105 }
 0x196   : > { %v2183_v62 = vsel %vm459_vm8, %v2181_v63, %v2141_v31  ;;  %v2168_v20 = vsel %vm459_vm8, %v2166_v48, %v2106_v14 }
 0x199   : > { %v2476_v58 = vpop.permute.xlu1 %2475 }
 0x19a   : > { %v2441_v5 = vpop.permute.xlu0 %2440  ;;  %v2524_v6 = vsel %vm452_vm6, %v4626_v55, %v2476_v58 }
 0x19b   : > { %v2509_v54 = vsel %vm452_vm6, %v4633_v26, %v2441_v5 }
 0x19d   : > { %v2146_v47 = vpop.permute.xlu1 %2145 }
 0x19e   : > { %v2111_v59 = vpop.permute.xlu0 %2110  ;;  %v2185_v23 = vsel %vm462_vm9, %v2183_v62, %v2146_v47 }
 0x19f   : > { %v2170_v40 = vsel %vm462_vm9, %v2168_v20, %v2111_v59 }
 0x1a1   : > { %v2481_v3 = vpop.permute.xlu1 %2480 }
 0x1a2   : > { %v2446_v15 = vpop.permute.xlu0 %2445  ;;  %v2526_v49 = vsel %vm456_vm7, %v2524_v6, %v2481_v3 }
 0x1a3   : > { %v2511_v12 = vsel %vm456_vm7, %v2509_v54, %v2446_v15 }
 0x1a5   : > { %v2151_v1 = vpop.permute.xlu1 %2150 }
 0x1a6   : > { %v2116_v53 = vpop.permute.xlu0 %2115  ;;  %v2187_v42 = vsel %vm465_vm10, %v2185_v23, %v2151_v1 }
 0x1a7   : > { %v2172_v50 = vsel %vm465_vm10, %v2170_v40, %v2116_v53 }
 0x1a9   : > { %v2486_v57 = vpop.permute.xlu1 %2485 }
 0x1aa   : > { %v2451_v29 = vpop.permute.xlu0 %2450  ;;  %v2528_v27 = vsel %vm459_vm8, %v2526_v49, %v2486_v57 }
 0x1ab   : > { %v2513_v19 = vsel %vm459_vm8, %v2511_v12, %v2451_v29 }
 0x1ad   : > { %v2156_v28 = vpop.permute.xlu1 %2155 }
 0x1ae   : > { %v2121_v2 = vpop.permute.xlu0 %2120  ;;  %v2189_v7 = vsel %vm468_vm11, %v2187_v42, %v2156_v28 }
 0x1af   : > { %v2174_v30 = vsel %vm468_vm11, %v2172_v50, %v2121_v2 }
 0x1b1   : > { %v2491_v21 = vpop.permute.xlu1 %2490 }
 0x1b2   : > { %v2456_v39 = vpop.permute.xlu0 %2455  ;;  %v2530_v52 = vsel %vm462_vm9, %v2528_v27, %v2491_v21 }
 0x1b3   : > { %v2515_v55 = vsel %vm462_vm9, %v2513_v19, %v2456_v39 }
 0x1b5   : > { %v2161_v38 = vpop.permute.xlu1 %2160 }
 0x1b6   : > { %v2191_v25 = vsel %vm471_vm12, %v2189_v7, %v2161_v38  ;;  %v2126_v13 = vpop.permute.xlu0 %2125 }
 0x1b7   : > { %v2176_v60 = vsel %vm471_vm12, %v2174_v30, %v2126_v13  ;;  %3429 = vmatprep.subr.msk.bf16.mxu1 %vm777_vm13, %v2191_v25 }
 0x1b8   : > { %v2195_v45 = vsel %vm777_vm13, %v2176_v60, 0 }
 0x1b9   : > { %2214 = vmatpush1.bf16.msra.mxu1 %v2195_v45  ;;  %v2496_v34 = vpop.permute.xlu1 %2495 }
 0x1ba   : > { %v2461_v11 = vpop.permute.xlu0 %2460  ;;  %v2532_v35 = vsel %vm465_vm10, %v2530_v52, %v2496_v34 }
 0x1bb   : > { %v2517_v26 = vsel %vm465_vm10, %v2515_v55, %v2461_v11  ;;  %v206_v11 = vld [vmem:[%s5150_s1 + $0x1c] sm:$0xf] }
 0x1bc   : > { %3430 = vmatmul.mubr.msk.bf16.vlgmr.msra.gmra.mxu1 %vm773_vm14, %v204_v16 }
 0x1bd   : > { %v2501_v17 = vpop.permute.xlu1 %2500  ;;  %2902 = vmatprep.mubr.bf16.mxu1 %v5212_v46 }
 0x1be   : > { %v2466_v56 = vpop.permute.xlu0 %2465  ;;  %v2534_v24 = vsel %vm468_vm11, %v2532_v35, %v2501_v17 }
 0x1bf   : > { %v2519_v8 = vsel %vm468_vm11, %v2517_v26, %v2466_v56 }
 0x1c1   : > { %v2506_v44 = vpop.permute.xlu1 %2505 }
 0x1c2   : > { %v2536_v43 = vsel %vm471_vm12, %v2534_v24, %v2506_v44  ;;  %v2471_v18 = vpop.permute.xlu0 %2470 }
 0x1c3   : > { %v2521_v61 = vsel %vm471_vm12, %v2519_v8, %v2471_v18  ;;  %3449 = vmatprep.subr.msk.bf16.mxu0 %vm777_vm13, %v2536_v43 }
 0x1c4   : > { %v2540_v0 = vsel %vm777_vm13, %v2521_v61, 0 }
 0x1c5   : > { %2559 = vmatpush1.bf16.msra.mxu0 %v2540_v0  ;;  %v2802_v9 = vpop.permute.xlu1 %2801 }
 0x1c6   : > { %v2767_v41 = vpop.permute.xlu0 %2766  ;;  %v2850_v37 = vsel %vm452_vm6, %v4862_v22, %v2802_v9  ;;  %v207_v9 = vld [vmem:[%s5150_s1 + $0x20] sm:$0xf] }
 0x1c8   : > { %3450 = vmatmul.mubr.msk.bf16.vlgmr.msra.gmra.mxu0 %vm773_vm14, %v205_v32 }
 0x1c9   : > { %v2807_v10 = vpop.permute.xlu1 %2806  ;;  %3228 = vmatprep.mubr.bf16.mxu0 %v5212_v46  ;;  %v2835_v46 = vsel %vm452_vm6, %v4865_v51, %v2767_v41 }
 0x1ca   : > { %v2772_v31 = vpop.permute.xlu0 %2771  ;;  %v2852_v63 = vsel %vm456_vm7, %v2850_v37, %v2807_v10 }
 0x1cb   : > { %v2837_v48 = vsel %vm456_vm7, %v2835_v46, %v2772_v31 }
 0x1cd   : > { %v2812_v14 = vpop.permute.xlu1 %2811 }
 0x1ce   : > { %v2777_v58 = vpop.permute.xlu0 %2776  ;;  %v2854_v62 = vsel %vm459_vm8, %v2852_v63, %v2812_v14 }
 0x1cf   : > { %v2839_v20 = vsel %vm459_vm8, %v2837_v48, %v2777_v58 }
 0x1d1   : > { %v3128_v5 = vpop.permute.xlu1 %3127 }
 0x1d2   : > { %v3093_v47 = vpop.permute.xlu0 %3092  ;;  %v3176_v49 = vsel %vm452_vm6, %v4939_v4, %v3128_v5 }
 0x1d3   : > { %v3161_v17 = vsel %vm452_vm6, %v4944_v36, %v3093_v47 }
 0x1d5   : > { %v2817_v59 = vpop.permute.xlu1 %2816 }
 0x1d6   : > { %v2782_v3 = vpop.permute.xlu0 %2781  ;;  %v2856_v23 = vsel %vm462_vm9, %v2854_v62, %v2817_v59 }
 0x1d7   : > { %v2841_v42 = vsel %vm462_vm9, %v2839_v20, %v2782_v3 }
 0x1d9   : > { %v3133_v15 = vpop.permute.xlu1 %3132 }
 0x1da   : > { %v3098_v1 = vpop.permute.xlu0 %3097  ;;  %v3178_v12 = vsel %vm456_vm7, %v3176_v49, %v3133_v15 }
 0x1db   : > { %v3163_v56 = vsel %vm456_vm7, %v3161_v17, %v3098_v1 }
 0x1dd   : > { %v2822_v53 = vpop.permute.xlu1 %2821 }
 0x1de   : > { %v2787_v57 = vpop.permute.xlu0 %2786  ;;  %v2858_v22 = vsel %vm465_vm10, %v2856_v23, %v2822_v53 }
 0x1df   : > { %v2843_v50 = vsel %vm465_vm10, %v2841_v42, %v2787_v57 }
 0x1e1   : > { %v3138_v29 = vpop.permute.xlu1 %3137 }
 0x1e2   : > { %v3103_v28 = vpop.permute.xlu0 %3102  ;;  %v3180_v19 = vsel %vm459_vm8, %v3178_v12, %v3138_v29 }
 0x1e3   : > { %v3165_v55 = vsel %vm459_vm8, %v3163_v56, %v3103_v28 }
 0x1e5   : > { %v2827_v2 = vpop.permute.xlu1 %2826 }
 0x1e6   : > { %v2792_v33 = vpop.permute.xlu0 %2791  ;;  %v2860_v51 = vsel %vm468_vm11, %v2858_v22, %v2827_v2 }
 0x1e7   : > { %v2845_v30 = vsel %vm468_vm11, %v2843_v50, %v2792_v33 }
 0x1e9   : > { %v3143_v21 = vpop.permute.xlu1 %3142 }
 0x1ea   : > { %v3108_v39 = vpop.permute.xlu0 %3107  ;;  %v3182_v35 = vsel %vm462_vm9, %v3180_v19, %v3143_v21  ;;  %v208_v19 = vld [vmem:[%s5151_s2] sm:$0xff] }
 0x1eb   : > { %v816_v40 = vpop.f32.mrf.mxu0  ;;  %v3167_v26 = vsel %vm462_vm9, %v3165_v55, %v3108_v39 }
 0x1ed   : > { %v2832_v7 = vpop.permute.xlu1 %2831  ;;  %v818_v38 = vpop.f32.mrf.mxu0 }
 0x1ee   : > { %v2862_v25 = vsel %vm471_vm12, %v2860_v51, %v2832_v7  ;;  %v2797_v13 = vpop.permute.xlu0 %2796 }
 0x1ef   : > { %v2847_v60 = vsel %vm471_vm12, %v2845_v30, %v2797_v13  ;;  %3465 = vmatprep.subr.msk.bf16.mxu1 %vm777_vm13, %v2862_v25  ;;  %v820_v45 = vpop.f32.mrf.mxu0 }
 0x1f0   : > { %v2866_v34 = vsel %vm777_vm13, %v2847_v60, 0 }
 0x1f1   : > { %2885 = vmatpush1.bf16.msra.mxu1 %v2866_v34  ;;  %v3148_v16 = vpop.permute.xlu1 %3147  ;;  %v821_v6 = vpop.f32.mrf.mxu0 }
 0x1f2   : > { %v3113_v54 = vpop.permute.xlu0 %3112  ;;  %v3184_v4 = vsel %vm465_vm10, %v3182_v35, %v3148_v16 }
 0x1f3   : > { %v3169_v24 = vsel %vm465_vm10, %v3167_v26, %v3113_v54 }
 0x1f4   : > { %3466 = vmatmul.mubr.msk.bf16.vlgmr.msra.gmra.mxu1 %vm773_vm14, %v206_v11 }
 0x1f5   : > { %v3153_v27 = vpop.permute.xlu1 %3152 }
 0x1f6   : > { %v3118_v52 = vpop.permute.xlu0 %3117  ;;  %v3186_v36 = vsel %vm468_vm11, %v3184_v4, %v3153_v27 }
 0x1f7   : > { %v3171_v8 = vsel %vm468_vm11, %v3169_v24, %v3118_v52 }
 0x1f9   : > { %v3158_v44 = vpop.permute.xlu1 %3157 }
 0x1fa   : > { %v3188_v43 = vsel %vm471_vm12, %v3186_v36, %v3158_v44  ;;  %v3123_v18 = vpop.permute.xlu0 %3122  ;;  %v209_v44 = vld [vmem:[%s5152_s3] sm:$0xff] }
 0x1fb   : > { %v3173_v61 = vsel %vm471_vm12, %v3171_v8, %v3123_v18  ;;  %3481 = vmatprep.subr.msk.bf16.mxu0 %vm777_vm13, %v3188_v43 }
 0x1fc   : > { %v3192_v0 = vsel %vm777_vm13, %v3173_v61, 0 }
 0x1fd   : > { %3211 = vmatpush1.bf16.msra.mxu0 %v3192_v0 }
 0x200   : > { %3482 = vmatmul.mubr.msk.bf16.vlgmr.msra.gmra.mxu0 %vm773_vm14, %v207_v9 }
 0x20b   : > { %v864_v32 = vpop.f32.mrf.mxu1 }
 0x20c   : > { %v865_v41 = vadd.f32 %v864_v32, %v816_v40 }
 0x20d   : > { %v866_v10 = vpop.f32.mrf.mxu1 }
 0x20e   : > { %v867_v31 = vadd.f32 %v866_v10, %v818_v38 }
 0x20f   : > { %v868_v14 = vpop.f32.mrf.mxu1 }
 0x211   : > { %v869_v58 = vpop.f32.mrf.mxu1 }
 0x217   : > { %v1188_v5 = vpop.f32.mrf.mxu0 }
 0x218   : > { %v1195_v47 = vadd.f32 %v1188_v5, %v865_v41 }
 0x219   : > { %v1190_v59 = vpop.f32.mrf.mxu0 }
 0x21a   : > { %v1196_v3 = vadd.f32 %v1190_v59, %v867_v31 }
 0x21b   : > { %v1192_v15 = vpop.f32.mrf.mxu0 }
 0x21d   : > { %v1193_v1 = vpop.f32.mrf.mxu0 }
 0x243   : > { %v1581_v53 = vpop.f32.mrf.mxu1 }
 0x244   : > { %v1588_v57 = vadd.f32 %v1581_v53, %v1195_v47 }
 0x245   : > { %v1583_v29 = vpop.f32.mrf.mxu1 }
 0x246   : > { %v1589_v28 = vadd.f32 %v1583_v29, %v1196_v3 }
 0x247   : > { %v1585_v2 = vpop.f32.mrf.mxu1 }
 0x249   : > { %v1586_v33 = vpop.f32.mrf.mxu1 }
 0x24f   : > { %v1907_v37 = vpop.f32.mrf.mxu0 }
 0x250   : > { %v1914_v46 = vadd.f32 %v1907_v37, %v1588_v57 }
 0x251   : > { %v1909_v63 = vpop.f32.mrf.mxu0 }
 0x252   : > { %v1915_v21 = vadd.f32 %v1909_v63, %v1589_v28 }
 0x253   : > { %v1911_v48 = vpop.f32.mrf.mxu0 }
 0x255   : > { %v1912_v62 = vpop.f32.mrf.mxu0 }
 0x27c   : > { %v2233_v39 = vpop.f32.mrf.mxu1 }
 0x27d   : > { %v2240_v20 = vadd.f32 %v2233_v39, %v1914_v46 }
 0x27e   : > { %v2235_v23 = vpop.f32.mrf.mxu1 }
 0x27f   : > { %v2241_v60 = vadd.f32 %v2235_v23, %v1915_v21 }
 0x280   : > { %v2237_v40 = vpop.f32.mrf.mxu1 }
 0x282   : > { %v2238_v42 = vpop.f32.mrf.mxu1 }
 0x288   : > { %v2578_v22 = vpop.f32.mrf.mxu0 }
 0x289   : > { %v2585_v45 = vadd.f32 %v2578_v22, %v2240_v20 }
 0x28a   : > { %v2580_v50 = vpop.f32.mrf.mxu0 }
 0x28b   : > { %v2586_v34 = vadd.f32 %v2580_v50, %v2241_v60 }
 0x28c   : > { %v2582_v51 = vpop.f32.mrf.mxu0 }
 0x28e   : > { %v2583_v7 = vpop.f32.mrf.mxu0 }
 0x2b4   : > { %v2904_v38 = vpop.f32.mrf.mxu1 }
 0x2b5   : > { %v2911_v11 = vadd.f32 %v2904_v38, %v2585_v45 }
 0x2b6   : > { %v2906_v30 = vpop.f32.mrf.mxu1 }
 0x2b7   : > { %v2912_v6 = vadd.f32 %v2906_v30, %v2586_v34 }
 0x2b8   : > { %v2908_v25 = vpop.f32.mrf.mxu1 }
 0x2ba   : > { %v2909_v13 = vpop.f32.mrf.mxu1 }
 0x2c0   : > { %v3230_v16 = vpop.f32.mrf.mxu0 }
 0x2c1   : > { %v3237_v49 = vadd.f32 %v3230_v16, %v2911_v11 }
 0x2c2   : > { %v3232_v54 = vpop.f32.mrf.mxu0 }
 0x2c3   : > { %v3238_v17 = vadd.f32 %v3232_v54, %v2912_v6 }
 0x2c4   : > { %v3234_v12 = vpop.f32.mrf.mxu0 }
 0x2c5   : > { %v3239_v27 = vadd.f32 %v3238_v17, %v3237_v49 }
 0x2c6   : > { %v3235_v56 = vpop.f32.mrf.mxu0 }
 0x2c7   : > { %3240 = vadd.xlane.f32.xlu0 %v3239_v27 }
 0x2dd   : > { %3258 = vperm.xlu0 %3579, %v208_v19  }
 0x350   : > { %v3241_v52 = vpop.xlane.xlu0 %3240 }
 0x351   : > { %v3243_v55 = vmul.f32 0.00390625, %v3241_v52 }
 0x353   : > { %v3244_v35 = vsub.f32 %v3237_v49, %v3243_v55  ;;  %v3245_v26 = vsub.f32 %v3238_v17, %v3243_v55 }
 0x355   : > { %v3246_v4 = vmul.f32 %v3244_v35, %v3244_v35  ;;  %v3247_v24 = vmul.f32 %v3245_v26, %v3245_v26 }
 0x357   : > { %v3248_v36 = vadd.f32 %v3247_v24, %v3246_v4 }
 0x358   : > { %v3259_v0 = vpop.permute.xlu0 %3258 }
 0x359   : > { %3249 = vadd.xlane.f32.xlu1 %v3248_v36 }
 0x36a   : > { %3265 = vperm.xlu1 %3580, %v209_v44  }
 0x3e2   : > { %v3250_v8 = vpop.xlane.xlu1 %3249 }
 0x3e3   : > { %v3251_v43 = vmul.f32 0.00390625, %v3250_v8 }
 0x3e5   : > { %v3252_v18 = vadd.f32 1e-05, %v3251_v43 }
 0x3e6   : > { %v3266_v41 = vpop.permute.xlu1 %3265 }
 0x3e7   : > { %3581 = vrsqrt.f32 %v3252_v18 }
 0x3f4   : > { %v3582_v61 = vpop.eup %3581 }
 0x3f5   : > { %v3254_v9 = vmul.f32 %v3582_v61, %v3244_v35  ;;  %v3255_v32 = vmul.f32 %v3582_v61, %v3245_v26 }
 0x3f7   : > { %v3261_v10 = vmul.f32 %v3259_v0, %v3254_v9  ;;  %v3262_v31 = vmul.f32 %v3259_v0, %v3255_v32 }
 0x3f9   : > { %v3268_v14 = vadd.f32 %v3266_v41, %v3261_v10  ;;  %v3269_v58 = vadd.f32 %v3266_v41, %v3262_v31 }
 0x3fb   : > { %3270 = vst [vmem:[%s197_s5] sm:$0xff] %v3268_v14  ;;  %3271 = vst [vmem:[%s197_s5 + $0x8] sm:$0xff] %v3269_v58 }
 0x3fc PF: > { %s14_s15 = sadd.s32 1, %s3589_s15  }
 0x3fd   : > { %p11_p4 = scmp.ge.s32.totalorder %s14_s15, 4  }
 0x3ff   :  { %13 = sbr.rel (!%p11_p4) target bundleno = 1 (0x1), region = 66 }

</bundles_post_ra>
